<compile_context>
chip_gen: v7x
topology: tpu7x:2x2x1
jax: 0.10.0
libtpu: 0.0.40
codegen_flags: <defaults>
</compile_context>

<pallas_src>
import functools

import jax
import jax.numpy as jnp
from jax.experimental import pallas as pl
from jax.experimental.pallas import tpu as pltpu


# ----------------------------------------------------------------------------
# Host-side: separable bilinear interpolation matrices (align_corners=True)
# ----------------------------------------------------------------------------
def bilinear_weight_matrix(out_size: int, in_size: int) -> jnp.ndarray:
    """W of shape (out_size, in_size) s.t. out = W @ in (1-D bilinear,
    align_corners=True, matching F.upsample(..., align_corners=True))."""
    if out_size == 1 or in_size == 1:
        src = jnp.zeros((out_size,), jnp.float32)
    else:
        src = jnp.arange(out_size, dtype=jnp.float32) * (in_size - 1) / (out_size - 1)
    lo = jnp.clip(jnp.floor(src).astype(jnp.int32), 0, in_size - 1)
    hi = jnp.minimum(lo + 1, in_size - 1)
    frac = src - lo.astype(jnp.float32)
    rows = jnp.arange(out_size)
    w = jnp.zeros((out_size, in_size), jnp.float32)
    w = w.at[rows, lo].add(1.0 - frac)
    w = w.at[rows, hi].add(frac)
    return w


# ----------------------------------------------------------------------------
# Tile selection from a VMEM budget (safe for v7x's 64 MiB as well as 128 MiB
# on v5e/v6e), plus a guarantee of >= 2 grid steps for v7x's 2 TensorCores.
# ----------------------------------------------------------------------------
def _choose_h_tile(H, W, C, hin, N, tgt_bytes,
                   vmem_budget=20 * 1024 * 1024, cap=512):
    def step_bytes(th):
        z = th * C * W * 4                       # (TH, C*W) matmul result
        soft = 6 * th * W * 4                    # m/sumexp/picked/per/tgt/valid
        dbuf = 2 * (hin * C * W * 4 + th * hin * 4 + th * W * tgt_bytes)
        out = 2 * 2 * W * 4
        return z + soft + dbuf + out

    cands = [t for t in range(min(H, cap), 7, -1) if H % t == 0 and t % 8 == 0]
    th = None
    for t in cands:
        if step_bytes(t) <= vmem_budget:
            th = t
            break
    if th is None:
        th = cands[-1] if cands else H
    # v7x has 2 TensorCores: make sure there are >= 2 parallel grid steps.
    if N * (H // th) < 2:
        for t in cands:
            if t < th:
                th = t
                break
    return th, step_bytes(th)


# ----------------------------------------------------------------------------
# Fused kernel: vertical bilinear upsample (one MXU matmul) + masked CE.
#   y_ref   : (1, hin, C*W) f32  horizontally pre-interpolated logits (batch n)
#   wh_ref  : (TH, hin)     f32  row-interpolation weights for this H tile
#   tgt_ref : (1, TH, W)    int8/int32 target labels for this tile
#   out_ref : (1, 1, 2, W)  f32  row 0 = per-lane loss sum, row 1 = valid count
# ----------------------------------------------------------------------------
def fused_upsample_ce_kernel(y_ref, wh_ref, tgt_ref, out_ref, *,
                             num_classes, width, ignore_value):
    C, W = num_classes, width
    y = y_ref[0]                            # (hin, C*W)
    wh = wh_ref[...]                        # (TH, hin)
    tgt = tgt_ref[0].astype(jnp.int32)      # (TH, W)  widen in-vreg only

    # Vertical interpolation for ALL channels in ONE MXU matmul.
    # Channel c occupies the static lane slice [:, c*W:(c+1)*W].
    z = jnp.dot(wh, y, preferred_element_type=jnp.float32)   # (TH, C*W)

    # Pass 1: running max over channels (only m + current slice live).
    m = z[:, 0:W]
    for c in range(1, C):
        m = jnp.maximum(m, z[:, c * W:(c + 1) * W])

    # Pass 2: online sum-exp + gather-by-compare (m, sumexp, picked live).
    sumexp = jnp.zeros_like(m)
    picked = jnp.zeros_like(m)
    for c in range(C):
        v = z[:, c * W:(c + 1) * W]
        sumexp = sumexp + jnp.exp(v - m)
        picked = picked + jnp.where(tgt == c, v, 0.0)

    lse = m + jnp.log(sumexp)
    valid = tgt != ignore_value
    per = jnp.where(valid, lse - picked, 0.0)                 # (TH, W)

    # Lane-dense partials: sublane (axis=0) reduce only; the cross-lane
    # reduce and the mean happen in plain JAX afterwards.
    loss_lane = jnp.sum(per, axis=0, keepdims=True)                       # (1, W)
    cnt_lane = jnp.sum(valid.astype(jnp.float32), axis=0, keepdims=True)  # (1, W)
    out_ref[0, 0] = jnp.concatenate([loss_lane, cnt_lane], axis=0)        # (2, W)


# ----------------------------------------------------------------------------
# Wrapper: Criterion.forward
# ----------------------------------------------------------------------------
def criterion_forward(preds, target, ignore_index=255):
    N, C, hin, win = preds.shape
    _, H, W = target.shape

    preds = preds.astype(jnp.float32)
    wh = bilinear_weight_matrix(H, hin)            # (H, hin)
    ww = bilinear_weight_matrix(W, win)            # (W, win)

    # Stage 1 (horizontal interp) hoisted to plain JAX: it is H-tile-invariant
    # and tiny.  Layout: y_slab[n, h_in, c*W + w_out].
    y = jnp.einsum('nchw,ow->ncho', preds, ww)              # (N, C, hin, W)
    y_slab = jnp.transpose(y, (0, 2, 1, 3)).reshape(N, hin, C * W)

    # Compact the label stream to int8 when representable (4x less target DMA).
    if C <= 127:
        ignore_value = ((int(ignore_index) + 128) % 256) - 128   # int8 image
        if 0 <= ignore_value < C:
            # would collide with a real class id -> keep int32
            tgt_packed = target.astype(jnp.int32)
            ignore_value = int(ignore_index)
            tgt_bytes = 4
        else:
            tgt_packed = jnp.where(target == ignore_index,
                                   jnp.int32(ignore_value),
                                   jnp.clip(target, -128, 127)).astype(jnp.int8)
            tgt_bytes = 1
    else:
        tgt_packed = target.astype(jnp.int32)
        ignore_value = int(ignore_index)
        tgt_bytes = 4

    TH, step_bytes = _choose_h_tile(H, W, C, hin, N, tgt_bytes)
    n_ht = H // TH

    kernel = functools.partial(fused_upsample_ce_kernel,
                               num_classes=C, width=W, ignore_value=ignore_value)

    vmem_limit = int(min(56 * 1024 * 1024,
                         max(32 * 1024 * 1024, 2 * step_bytes)))

    cost = pl.CostEstimate(
        flops=int(2 * N * H * hin * C * W),
        transcendentals=int((C + 1) * N * H * W),
        bytes_accessed=int(n_ht * N * hin * C * W * 4      # y slab (refetched per tile)
                           + N * H * hin * 4               # wh
                           + N * H * W * tgt_bytes         # target stream
                           + N * n_ht * 2 * W * 4),        # partial outputs
    )

    stats = pl.pallas_call(
        kernel,
        out_shape=jax.ShapeDtypeStruct((N, n_ht, 2, W), jnp.float32),
        grid=(N, n_ht),
        in_specs=[
            pl.BlockSpec((1, hin, C * W), lambda n, t: (n, 0, 0)),
            pl.BlockSpec((TH, hin), lambda n, t: (t, 0)),
            pl.BlockSpec((1, TH, W), lambda n, t: (n, t, 0)),
        ],
        out_specs=pl.BlockSpec((1, 1, 2, W), lambda n, t: (n, t, 0, 0)),
        compiler_params=pltpu.CompilerParams(
            dimension_semantics=("parallel", "parallel"),
            vmem_limit_bytes=vmem_limit,
        ),
        cost_estimate=cost,
    )(y_slab, wh, tgt_packed)

    # reduction='mean' with ignore_index: mean over valid pixels only.
    # (NaN if no valid pixel, same as PyTorch.)
    return jnp.sum(stats[:, :, 0, :]) / jnp.sum(stats[:, :, 1, :])


# ----------------------------------------------------------------------------
# Pure-JAX reference (same math) for a sanity check.
# ----------------------------------------------------------------------------
def criterion_reference(preds, target, ignore_index=255):
    N, C, hin, win = preds.shape
    _, H, W = target.shape
    wh = bilinear_weight_matrix(H, hin)
    ww = bilinear_weight_matrix(W, win)
    up = jnp.einsum("oh,nchw,pw->ncop", wh, preds.astype(jnp.float32), ww)
    logits = up.transpose(0, 2, 3, 1).reshape(-1, C)
    tgt = target.reshape(-1)
    lse = jax.scipy.special.logsumexp(logits, axis=-1)
    picked = jnp.take_along_axis(
        logits, jnp.clip(tgt, 0, C - 1)[:, None], axis=-1
    )[:, 0]
    per = lse - picked
    valid = tgt != ignore_index
    return jnp.sum(jnp.where(valid, per, 0.0)) / jnp.sum(valid.astype(jnp.float32))


if __name__ == "__main__":
    key = jax.random.PRNGKey(0)
    k1, k2 = jax.random.split(key)

    N, C = 2, 4            # batch, num classes
    hin, win = 16, 16      # prediction spatial size (pre-upsample)
    H, W = 128, 128        # target spatial size (lane-dense W)

    preds = jax.random.normal(k1, (N, C, hin, win), dtype=jnp.float32)
    target = jax.random.randint(k2, (N, H, W), 0, C).astype(jnp.int32)
    # Exercise ignore_index masking.
    target = target.at[0, :8, :].set(255)

    loss = criterion_forward(preds, target)
    jax.block_until_ready(loss)

    ref = criterion_reference(preds, target)
    assert jnp.allclose(loss, ref, atol=1e-4, rtol=1e-4), (loss, ref)

    print("KERNEL_OK")
</pallas_src>

<mosaic_0001>
module attributes {stable_mosaic.version = 11 : i64} {
  func.func @fused_upsample_ce_kernel(%arg0: i32, %arg1: i32, %arg2: memref<1x16x512xf32, #tpu.memory_space<vmem>>, %arg3: memref<128x16xf32, #tpu.memory_space<vmem>>, %arg4: memref<1x128x128xi8, #tpu.memory_space<vmem>>, %arg5: memref<1x1x2x128xf32, #tpu.memory_space<vmem>>) attributes {dimension_semantics = [#tpu.dimension_semantics<parallel>, #tpu.dimension_semantics<parallel>], iteration_bounds = array<i64: 2, 1>, scalar_prefetch = 0 : i64, scratch_operands = 0 : i64, tpu.core_type = #tpu.core_type<tc>, window_params = [{transform_indices = @transform_0, window_bounds = array<i64: 1, 16, 512>}, {transform_indices = @transform_1, window_bounds = array<i64: 128, 16>}, {transform_indices = @transform_2, window_bounds = array<i64: 1, 128, 128>}, {transform_indices = @transform_3, window_bounds = array<i64: 1, 1, 2, 128>}]} {
    %c0 = arith.constant 0 : index
    %c0_0 = arith.constant 0 : index
    %c0_1 = arith.constant 0 : index
    %0 = vector.load %arg2[%c0, %c0_0, %c0_1] : memref<1x16x512xf32, #tpu.memory_space<vmem>>, vector<1x16x512xf32>
    %1 = vector.shape_cast %0 : vector<1x16x512xf32> to vector<16x512xf32>
    %c0_2 = arith.constant 0 : index
    %c0_3 = arith.constant 0 : index
    %2 = vector.load %arg3[%c0_2, %c0_3] : memref<128x16xf32, #tpu.memory_space<vmem>>, vector<128x16xf32>
    %c0_4 = arith.constant 0 : index
    %c0_5 = arith.constant 0 : index
    %c0_6 = arith.constant 0 : index
    %3 = vector.load %arg4[%c0_4, %c0_5, %c0_6] : memref<1x128x128xi8, #tpu.memory_space<vmem>>, vector<1x128x128xi8>
    %4 = vector.shape_cast %3 : vector<1x128x128xi8> to vector<128x128xi8>
    %5 = arith.extsi %4 : vector<128x128xi8> to vector<128x128xi32>
    %cst = arith.constant dense<0.000000e+00> : vector<128x512xf32>
    %6 = tpu.matmul %2, %1, %cst {dimension_numbers = #tpu.dot_dimension_numbers<[1], [0], [0], [1], [0, 0, 1, 1], [], []>} : vector<128x16xf32>, vector<16x512xf32>, vector<128x512xf32> -> vector<128x512xf32>
    %7 = vector.extract_strided_slice %6 {offsets = [0, 0], sizes = [128, 128], strides = [1, 1]} : vector<128x512xf32> to vector<128x128xf32>
    %8 = vector.extract_strided_slice %6 {offsets = [0, 128], sizes = [128, 128], strides = [1, 1]} : vector<128x512xf32> to vector<128x128xf32>
    %9 = arith.maximumf %7, %8 : vector<128x128xf32>
    %10 = vector.extract_strided_slice %6 {offsets = [0, 256], sizes = [128, 128], strides = [1, 1]} : vector<128x512xf32> to vector<128x128xf32>
    %11 = arith.maximumf %9, %10 : vector<128x128xf32>
    %12 = vector.extract_strided_slice %6 {offsets = [0, 384], sizes = [128, 128], strides = [1, 1]} : vector<128x512xf32> to vector<128x128xf32>
    %13 = arith.maximumf %11, %12 : vector<128x128xf32>
    %cst_7 = arith.constant 0.000000e+00 : f32
    %14 = vector.broadcast %cst_7 : f32 to vector<128x128xf32>
    %cst_8 = arith.constant 0.000000e+00 : f32
    %15 = vector.broadcast %cst_8 : f32 to vector<128x128xf32>
    %16 = vector.extract_strided_slice %6 {offsets = [0, 0], sizes = [128, 128], strides = [1, 1]} : vector<128x512xf32> to vector<128x128xf32>
    %17 = arith.subf %16, %13 : vector<128x128xf32>
    %18 = math.exp %17 : vector<128x128xf32>
    %19 = arith.addf %14, %18 : vector<128x128xf32>
    %c0_i32 = arith.constant 0 : i32
    %20 = vector.broadcast %c0_i32 : i32 to vector<128x128xi32>
    %21 = arith.cmpi eq, %5, %20 : vector<128x128xi32>
    %cst_9 = arith.constant 0.000000e+00 : f32
    %22 = vector.broadcast %cst_9 : f32 to vector<128x128xf32>
    %23 = arith.select %21, %16, %22 : vector<128x128xi1>, vector<128x128xf32>
    %24 = arith.addf %15, %23 : vector<128x128xf32>
    %25 = vector.extract_strided_slice %6 {offsets = [0, 128], sizes = [128, 128], strides = [1, 1]} : vector<128x512xf32> to vector<128x128xf32>
    %26 = arith.subf %25, %13 : vector<128x128xf32>
    %27 = math.exp %26 : vector<128x128xf32>
    %28 = arith.addf %19, %27 : vector<128x128xf32>
    %c1_i32 = arith.constant 1 : i32
    %29 = vector.broadcast %c1_i32 : i32 to vector<128x128xi32>
    %30 = arith.cmpi eq, %5, %29 : vector<128x128xi32>
    %cst_10 = arith.constant 0.000000e+00 : f32
    %31 = vector.broadcast %cst_10 : f32 to vector<128x128xf32>
    %32 = arith.select %30, %25, %31 : vector<128x128xi1>, vector<128x128xf32>
    %33 = arith.addf %24, %32 : vector<128x128xf32>
    %34 = vector.extract_strided_slice %6 {offsets = [0, 256], sizes = [128, 128], strides = [1, 1]} : vector<128x512xf32> to vector<128x128xf32>
    %35 = arith.subf %34, %13 : vector<128x128xf32>
    %36 = math.exp %35 : vector<128x128xf32>
    %37 = arith.addf %28, %36 : vector<128x128xf32>
    %c2_i32 = arith.constant 2 : i32
    %38 = vector.broadcast %c2_i32 : i32 to vector<128x128xi32>
    %39 = arith.cmpi eq, %5, %38 : vector<128x128xi32>
    %cst_11 = arith.constant 0.000000e+00 : f32
    %40 = vector.broadcast %cst_11 : f32 to vector<128x128xf32>
    %41 = arith.select %39, %34, %40 : vector<128x128xi1>, vector<128x128xf32>
    %42 = arith.addf %33, %41 : vector<128x128xf32>
    %43 = vector.extract_strided_slice %6 {offsets = [0, 384], sizes = [128, 128], strides = [1, 1]} : vector<128x512xf32> to vector<128x128xf32>
    %44 = arith.subf %43, %13 : vector<128x128xf32>
    %45 = math.exp %44 : vector<128x128xf32>
    %46 = arith.addf %37, %45 : vector<128x128xf32>
    %c3_i32 = arith.constant 3 : i32
    %47 = vector.broadcast %c3_i32 : i32 to vector<128x128xi32>
    %48 = arith.cmpi eq, %5, %47 : vector<128x128xi32>
    %cst_12 = arith.constant 0.000000e+00 : f32
    %49 = vector.broadcast %cst_12 : f32 to vector<128x128xf32>
    %50 = arith.select %48, %43, %49 : vector<128x128xi1>, vector<128x128xf32>
    %51 = arith.addf %42, %50 : vector<128x128xf32>
    %52 = math.log %46 : vector<128x128xf32>
    %53 = arith.addf %13, %52 : vector<128x128xf32>
    %c-1_i32 = arith.constant -1 : i32
    %54 = vector.broadcast %c-1_i32 : i32 to vector<128x128xi32>
    %55 = arith.cmpi ne, %5, %54 : vector<128x128xi32>
    %56 = arith.subf %53, %51 : vector<128x128xf32>
    %cst_13 = arith.constant 0.000000e+00 : f32
    %57 = vector.broadcast %cst_13 : f32 to vector<128x128xf32>
    %58 = arith.select %55, %56, %57 : vector<128x128xi1>, vector<128x128xf32>
    %cst_14 = arith.constant dense<0.000000e+00> : vector<128xf32>
    %59 = vector.multi_reduction <add>, %58, %cst_14 [0] : vector<128x128xf32> to vector<128xf32>
    %60 = vector.shape_cast %59 : vector<128xf32> to vector<1x128xf32>
    %61 = arith.extui %55 : vector<128x128xi1> to vector<128x128xi32>
    %62 = arith.sitofp %61 : vector<128x128xi32> to vector<128x128xf32>
    %cst_15 = arith.constant dense<0.000000e+00> : vector<128xf32>
    %63 = vector.multi_reduction <add>, %62, %cst_15 [0] : vector<128x128xf32> to vector<128xf32>
    %64 = vector.shape_cast %63 : vector<128xf32> to vector<1x128xf32>
    %65 = tpu.concatenate %60, %64 in 0 : vector<1x128xf32>, vector<1x128xf32> -> vector<2x128xf32>
    %c0_16 = arith.constant 0 : index
    %c0_17 = arith.constant 0 : index
    %c0_18 = arith.constant 0 : index
    %c0_19 = arith.constant 0 : index
    %66 = vector.load %arg5[%c0_16, %c0_17, %c0_18, %c0_19] : memref<1x1x2x128xf32, #tpu.memory_space<vmem>>, vector<1x1x2x128xf32>
    %67 = vector.shape_cast %66 : vector<1x1x2x128xf32> to vector<2x128xf32>
    %68 = vector.shape_cast %65 : vector<2x128xf32> to vector<1x1x2x128xf32>
    tpu.vector_store %arg5[%c0_16, %c0_17, %c0_18, %c0_19], %68 {strides = array<i32>} : memref<1x1x2x128xf32, #tpu.memory_space<vmem>>, vector<1x1x2x128xf32>,
    return
  }
  func.func @transform_0(%arg0: i32, %arg1: i32) -> (i32, i32, i32) {
    %c0_i32 = arith.constant 0 : i32
    %c0_i32_0 = arith.constant 0 : i32
    %c0_i32_1 = arith.constant 0 : i32
    return %arg0, %c0_i32, %c0_i32_0 : i32, i32, i32
  }
  func.func @transform_1(%arg0: i32, %arg1: i32) -> (i32, i32) {
    %c0_i32 = arith.constant 0 : i32
    %c0_i32_0 = arith.constant 0 : i32
    return %arg1, %c0_i32 : i32, i32
  }
  func.func @transform_2(%arg0: i32, %arg1: i32) -> (i32, i32, i32) {
    %c0_i32 = arith.constant 0 : i32
    %c0_i32_0 = arith.constant 0 : i32
    return %arg0, %arg1, %c0_i32 : i32, i32, i32
  }
  func.func @transform_3(%arg0: i32, %arg1: i32) -> (i32, i32, i32, i32) {
    %c0_i32 = arith.constant 0 : i32
    %c0_i32_0 = arith.constant 0 : i32
    %c0_i32_1 = arith.constant 0 : i32
    return %arg0, %arg1, %c0_i32, %c0_i32_0 : i32, i32, i32, i32
  }
}

</mosaic_0001>

<bundles_post_ra>
// kernel: tpu_custom_call.1
= control target key start
LH: loop header
LB: loop body
LE: loop exit
PB: predicated region body
PF: predicated region fallthrough
CT: control target
= control target key end

     0   :  { %8 = vsyncpa [#allocation3], 0  ;;  %s2943_s0 = inlined_call_operand.vmem [shape: f32[2,16,512], index: 0, kind: input, shape index: {}]   ;;  %s2944_s1 = inlined_call_operand.vmem [shape: f32[128,16], index: 1, kind: input, shape index: {}]   ;;  %s2945_s2 = inlined_call_operand.hbm [shape: s8[2,128,128], index: 2, kind: input, shape index: {}]   ;;  %s2946_s3 = inlined_call_operand.hbm [shape: f32[2,1,2,128], index: 3, kind: output, shape index: {}]  }
   0x1   :  { %10 = vsyncpa [#allocation3 + $0x1], 0 }
   0x2   :  { %11 = vsyncpa [#allocation4], 0 }
   0x3   :  { %13 = vsyncpa [#allocation4 + $0x1], 0  ;;  %s1897_s12 = smov 0   ;;  %s1899_s13 = smov 0  }
   0x4   :  { %s1901_s14 = smov 0   ;;  %s1903_s15 = smov 0  }
   0x5   :  { %s1905_s16 = smov 0   ;;  %s1907_s17 = smov 0  }
   0x6 LB: > { %s1458_s18 = sadd.s32 4294967295, %s1870_s17   ;;  %s1459_s19 = sadd.s32 4294967294, %s1870_s17   ;;  %s1870_s17 = sphi %s1907_s17, %s19_s17   ;;  %s1866_s16 = sphi %s1905_s16, %s3008_s16   ;;  %s1862_s15 = sphi %s1903_s15, %s3007_s15   ;;  %s1858_s14 = sphi %s1901_s14, %s3006_s14   ;;  %s1854_s13 = sphi %s1899_s13, %s3005_s13   ;;  %s1850_s12 = sphi %s1897_s12, %s3004_s12  }
   0x7   : > { %s31_s20 = sadd.s32 1, %s1866_s16  ;;  %s92_s21 = sadd.s32 1, %s1858_s14 }
   0x8   : > { %p33_p0 = scmp.ge.s32.totalorder %s31_s20, 2  ;;  %p99_p1 = scmp.ne.s32.totalorder %s1858_s14, %s1854_s13 }
   0x9   : > { %p100_p2 = scmp.eq.s32.totalorder %s1870_s17, 0  ;;  %p105_p3 = scmp.ne.s32.totalorder %s1854_s13, %s1850_s12 }
   0xa   : > { %s3010_s20 = smov (%p33_p0, %s31_s20), 0  ;;  %p106_p5 = scmp.eq.s32.totalorder %s1458_s18, 0 }
   0xb   : > { %p1938_p4 = por %p100_p2, %p99_p1  ;;  %s87_s23 = ssub.s32 %s1866_s16, %s3010_s20 }
   0xc   : > { %p131_p6 = scmp.eq.s32.totalorder %s1458_s18, 1  ;;  %p90_p7 = scmp.eq.s32.totalorder %s87_s23, 0 }
   0xd   : > { %p1944_p8 = por %p106_p5, %p105_p3  ;;  %p137_p10 = scmp.eq.s32.totalorder %s1459_s19, 1 }
   0xe   : > { %p1948_p9 = por %p131_p6, %p99_p1  ;;  %p1545_p13 = scmp.lt.s32.totalorder %s1870_s17, 2 }
   0xf   : > { %s1953_s26 = scalar_select %p90_p7, %s1858_s14, %s92_s21  }
  0x10   : > { %s2966_s25 = scalar_select %p1948_p9, 1, 0 }
  0x11   : > { %p1955_p11 = por %p137_p10, %p105_p3  ;;  %s174_s28 = sand.u32 1, %s1858_s14  }
  0x12   : > { %s1463_s29 = sshll.u32 %s174_s28, 5  ;;  %s1523_s30 = sshll.u32 %s1866_s16, 9 }
  0x13   : > { %s2967_s27 = scalar_select %p1955_p11, 1, 0 }
  0x14   : > { %s1966_s6 = scalar_lea.hbm %s2945_s2, %s1523_s30  ;;  %s178_s7 = scalar_lea.vmem [#allocation2], %s1463_s29 }
  0x15   : > { %s187_s8 = sshll.u32 %s178_s7, 4  ;;  %p1972_p0 = pnand %p1545_p13, %p1938_p4  ;;  %s1968_s8 = int_to_ptr.vmem [resolvable:$true] %s187_s8 }
  0x16   : > { %s1977_s10 = scalar_lea.sflag [#allocation3], %s174_s28  ;;  %s1758_s11 = scalar_lea.hbm %s1966_s6, 512 }
  0x17   : > { %p1759_p2 = scmp.ne.s32.totalorder %s1966_s6, %s1758_s11  ;;  %p1760_p3 = pneg %p1972_p0 }
  0x18   : > { %s1763_s21 = scalar_lea.hbm %s2945_s2, 1024  ;;  %p1764_p4 = scmp.lt.u32.totalorder %s1966_s6, %s2945_s2 }
  0x19   : > { %p1761_p5 = pnand %p1760_p3, %p1759_p2  ;;  %p1765_p7 = scmp.lt.u32.totalorder %s1763_s21, %s1758_s11 }
  0x1a   : > { %p1767_p13 = scmp.lt.u32.totalorder %s1758_s11, %s1966_s6 }
  0x1b   : > { %p1762_p6 = pneg %p1761_p5  ;;  %p1766_p10 = por %p1765_p7, %p1764_p4 }
  0x1d   : > { %p1768_p12 = por %p1767_p13, %p1766_p10 }
  0x1f   : > { %p1769_p1 = pnand %p1768_p12, %p1762_p6 }
  0x21   : > { %1772 = shalt.err (!%p1769_p1)
}
  0x22   : > { %s1773_s28 = scalar_lea.vmem %s1968_s8, 512  ;;  %s1872_s29 = smov [#allocation2]  }
  0x23   : > { %p1774_p2 = scmp.ne.s32.totalorder %s1968_s8, %s1773_s28  ;;  %s1778_s30 = sshll.u32 %s1872_s29, 4  ;;  %s1779_s30 = int_to_ptr.vmem [resolvable:$false] %s1778_s30 }
  0x24   : > { %s1780_s4 = scalar_lea.vmem %s1779_s30, 1024  ;;  %p1781_p9 = scmp.lt.s32.totalorder %s1968_s8, %s1779_s30 }
  0x25   : > { %p1776_p5 = pnand %p1774_p2, %p1760_p3  ;;  %p1782_p4 = scmp.lt.s32.totalorder %s1780_s4, %s1773_s28 }
  0x27   : > { %p1777_p11 = pneg %p1776_p5  ;;  %p1783_p7 = por %p1782_p4, %p1781_p9 }
  0x29   : > { %p1784_p10 = pnand %p1783_p7, %p1777_p11 }
  0x2b   : > { %1787 = shalt.err (!%p1784_p10)
}
  0x2c   : > { %s1873_s5 = smov 128   ;;  %s1874_s7 = smov 8  }
  0x2d   : > { %1540 = dma.hbm_to_vmem [thread:$0]  (!%p1972_p0), %s1966_s6, 512, %s1968_s8, %s1977_s10, %s1873_s5, %s1873_s5, %s1874_s7  }
  0x2e   : > { %p195_p12 = scmp.lt.s32.totalorder %s1870_s17, 3  ;;  %p2969_p1 = scmp.ge.s32.totalorder %s1870_s17, 1 }
  0x30   : > { %p196_p3 = pnand %p2969_p1, %p195_p12 }
  0x32   : > { %199 = sbr.rel (%p196_p3) target bundleno = 483 (0x1e3), region = 32 }
  0x39   : > { %s2009_s11 = sand.u32 1, %s1854_s13  }
  0x3a   : > { %s1467_s18 = sshll.u32 %s2009_s11, 5  ;;  %s202_s19 = scalar_lea.sflag [#allocation3], %s2009_s11 }
  0x3b   : > { %s2013_s21 = scalar_lea.vmem [#allocation2], %s1467_s18 }
  0x3c   : > { %1841 = dma.done.wait (%p1944_p8), %s202_s19, 512  }
  0x3d   : > { %1843 = vsyncadd (%p1944_p8), %s202_s19, 4294966784  ;;  %p238_p9 = scmp.lt.s32.totalorder %s1862_s15, 1  ;;  %v2952_v0 = vmov 0.0   ;;  %v258_v13 = vld [vmem:[%s2944_s1] sm:$0xff]  ;;  %vm294_vm0 = vcmask 130048   ;;  %v259_v14 = vld [vmem:[%s2944_s1 + $0x8] sm:$0xff] }
  0x3e   : > { %407 = vmatprep.mubr.f32.mxu0 %v2952_v0  ;;  %568 = vmatprep.mubr.f32.mxu1 %v2952_v0  ;;  %v260_v15 = vld [vmem:[%s2944_s1 + $0x10] sm:$0xff]  ;;  %v261_v16 = vld [vmem:[%s2944_s1 + $0x18] sm:$0xff]  ;;  %v262_v17 = vld [vmem:[%s2944_s1 + $0x20] sm:$0xff]  ;;  %s1520_s28 = sshll.u32 %s1862_s15, 5  ;;  %s1335_s18 = scalar_lea.sflag [#allocation4], %s2009_s11 }
  0x3f   : > { %s239_s6 = scalar_select %p238_p9, %s1862_s15, 1  ;;  %v263_v18 = vld [vmem:[%s2944_s1 + $0x28] sm:$0xff]  ;;  %v264_v19 = vld [vmem:[%s2944_s1 + $0x30] sm:$0xff]  ;;  %v265_v20 = vld [vmem:[%s2944_s1 + $0x38] sm:$0xff] }
  0x40   : > { %v266_v21 = vld [vmem:[%s2944_s1 + $0x40] sm:$0xff]  ;;  %v267_v22 = vld [vmem:[%s2944_s1 + $0x48] sm:$0xff]  ;;  %v268_v23 = vld [vmem:[%s2944_s1 + $0x50] sm:$0xff]  ;;  %s2894_s7 = scalar_lea.hbm %s2946_s3, %s1520_s28  ;;  %p3001_p11 = scmp.ne.s32.totalorder %s2966_s25, 0 }
  0x41   : > { %s1524_s8 = sshll.u32 %s239_s6, 6  ;;  %v269_v24 = vld [vmem:[%s2944_s1 + $0x58] sm:$0xff]  ;;  %v270_v25 = vld [vmem:[%s2944_s1 + $0x60] sm:$0xff]  ;;  %v271_v26 = vld [vmem:[%s2944_s1 + $0x68] sm:$0xff]  ;;  %s1876_s15 = smov [#allocation5]  }
  0x42   : > { %s242_s22 = scalar_lea.vmem %s2943_s0, %s1524_s8  ;;  %v272_v27 = vld [vmem:[%s2944_s1 + $0x70] sm:$0xff]  ;;  %v273_v28 = vld [vmem:[%s2944_s1 + $0x78] sm:$0xff]  ;;  %v274_v29 = vld [vmem:[%s2013_s21] sm:$0xff]  ;;  %s1792_s6 = sshll.u32 %s1876_s15, 4  ;;  %s1793_s6 = int_to_ptr.vmem [resolvable:$false] %s1792_s6 }
  0x43   : > { %v251_v1 = vld [vmem:[%s242_s22 + $0x8] sm:$0xff]  ;;  %v250_v3 = vld [vmem:[%s242_s22] sm:$0xff]  ;;  %v253_v6 = vld [vmem:[%s242_s22 + $0x18] sm:$0xff]  ;;  %v2137_v30 = vunpack.c.0.s8 %v274_v29  ;;  %v2139_v31 = vunpack.c.1.s8 %v274_v29  ;;  %v2149_v34 = vunpack.c.2.s8 %v274_v29  ;;  %v2155_v37 = vunpack.c.3.s8 %v274_v29  ;;  %s1794_s8 = scalar_lea.vmem %s1793_s6, 64 }
  0x44   : > { %v255_v2 = vld [vmem:[%s242_s22 + $0x28] sm:$0xff]  ;;  %v254_v5 = vld [vmem:[%s242_s22 + $0x20] sm:$0xff]  ;;  %v257_v7 = vld [vmem:[%s242_s22 + $0x38] sm:$0xff] }
  0x45   : > { %v1525_v4 = vpack.c.bf16 %v255_v2, %v251_v1  ;;  %v1527_v8 = vpack.c.bf16 %v254_v5, %v250_v3  ;;  %v1529_v9 = vpack.c.bf16 %v257_v7, %v253_v6  ;;  %v252_v10 = vld [vmem:[%s242_s22 + $0x10] sm:$0xff]  ;;  %vm1209_vm1 = vcmp.ne.s32.totalorder %v2137_v30, 4294967295  ;;  %v275_v38 = vld [vmem:[%s2013_s21 + $0x8] sm:$0xff]  ;;  %v277_v57 = vld [vmem:[%s2013_s21 + $0x18] sm:$0xff] }
  0x46   : > { %v256_v11 = vld [vmem:[%s242_s22 + $0x30] sm:$0xff]  ;;  %vm1210_vm2 = vcmp.ne.s32.totalorder %v2139_v31, 4294967295  ;;  %v1503_v32 = vsel %vm1209_vm1, 1.0, %v2952_v0  ;;  %vm1211_vm3 = vcmp.ne.s32.totalorder %v2149_v34, 4294967295  ;;  %vm1212_vm4 = vcmp.ne.s32.totalorder %v2155_v37, 4294967295 }
  0x47   : > { %1526 = vmatprep.subr.bf16.mxu0 %v1525_v4  ;;  %v1531_v12 = vpack.c.bf16 %v256_v11, %v252_v10  ;;  %1530 = vmatprep.subr.bf16.mxu1 %v1529_v9  ;;  %v1504_v33 = vsel %vm1210_vm2, 1.0, %v2952_v0  ;;  %v1505_v36 = vsel %vm1211_vm3, 1.0, %v2952_v0  ;;  %v1506_v40 = vsel %vm1212_vm4, 1.0, %v2952_v0  ;;  %v276_v51 = vld [vmem:[%s2013_s21 + $0x10] sm:$0xff]  ;;  %s1468_s21 = sshll.u32 %s2009_s11, 1 }
  0x48   : > { %1528 = vmatpush1.bf16.msra.mxu0 %v1527_v8  ;;  %v1310_v35 = vadd.f32 %v1504_v33, %v1503_v32  ;;  %v2162_v41 = vunpack.c.0.s8 %v275_v38  ;;  %v2168_v44 = vunpack.c.1.s8 %v275_v38  ;;  %v2174_v47 = vunpack.c.2.s8 %v275_v38  ;;  %s237_s29 = scalar_lea.vmem [#allocation5], %s1468_s21 }
  0x49   : > { %1532 = vmatpush1.bf16.msra.mxu1 %v1531_v12  ;;  %v2180_v50 = vunpack.c.3.s8 %v275_v38  ;;  %vm777_vm9 = vcmp.eq.s32.totalorder %v2137_v30, 0  ;;  %vm889_vm10 = vcmp.eq.s32.totalorder %v2137_v30, 1  ;;  %vm1001_vm11 = vcmp.eq.s32.totalorder %v2137_v30, 2  ;;  %s1349_s30 = sshll.u32 %s237_s29, 4  ;;  %s2896_s30 = int_to_ptr.vmem [resolvable:$true] %s1349_s30 }
  0x4a   : > { %v1311_v39 = vadd.f32 %v1505_v36, %v1310_v35  ;;  %vm2951_vm5 = vcmp.ne.s32.totalorder %v2162_v41, 4294967295  ;;  %vm2950_vm6 = vcmp.ne.s32.totalorder %v2168_v44, 4294967295  ;;  %2970 = vst [vmem:[#allocation8_spill] sm:$0xff] %v2174_v47  ;;  %vm2949_vm7 = vcmp.ne.s32.totalorder %v2174_v47, 4294967295  ;;  %s1788_s19 = scalar_lea.vmem %s2896_s30, 32  ;;  %p1795_p13 = scmp.lt.s32.totalorder %s2896_s30, %s1793_s6 }
  0x4b   : > { %1471 = vmatmul.mubr.msk.f32.vlgmr.msra.gmra.mrb[0].mxu0 %vm294_vm0, %v258_v13  ;;  %v1507_v43 = vsel %vm2951_vm5, 1.0, %v2952_v0  ;;  %v1508_v46 = vsel %vm2950_vm6, 1.0, %v2952_v0  ;;  %v1509_v49 = vsel %vm2949_vm7, 1.0, %v2952_v0  ;;  %2971 = vst [vmem:[#allocation9_spill] sm:$0xff] %v2180_v50  ;;  %vm2948_vm8 = vcmp.ne.s32.totalorder %v2180_v50, 4294967295  ;;  %p1789_p8 = scmp.ne.s32.totalorder %s2896_s30, %s1788_s19  ;;  %p1796_p2 = scmp.lt.s32.totalorder %s1794_s8, %s1788_s19 }
  0x4c   : > { %1487 = vmatmul.mubr.msk.f32.vlgmr.msra.gmra.mrb[0].mxu1 %vm294_vm0, %v258_v13  ;;  %413 = vmatprep.mubr.f32.mxu0 %v2952_v0  ;;  %v1312_v42 = vadd.f32 %v1506_v40, %v1311_v39  ;;  %v1510_v53 = vsel %vm2948_vm8, 1.0, %v2952_v0  ;;  %v2190_v54 = vunpack.c.0.s8 %v276_v51  ;;  %vm1113_vm12 = vcmp.eq.s32.totalorder %v2137_v30, 3 }
  0x4d   : > { %574 = vmatprep.mubr.f32.mxu1 %v2952_v0  ;;  %vm778_vm13 = vcmp.eq.s32.totalorder %v2139_v31, 0  ;;  %vm890_vm14 = vcmp.eq.s32.totalorder %v2139_v31, 1  ;;  %vm1002_vm15 = vcmp.eq.s32.totalorder %v2139_v31, 2  ;;  %vm779_vm8 = vcmp.eq.s32.totalorder %v2149_v34, 0  ;;  %p1790_p0 = pnand %p1789_p8, %p3001_p11  ;;  %p1797_p5 = por %p1796_p2, %p1795_p13 }
  0x4e   : > { %v1313_v45 = vadd.f32 %v1507_v43, %v1312_v42  ;;  %vm1217_vm7 = vcmp.ne.s32.totalorder %v2190_v54, 4294967295  ;;  %vm891_vm6 = vcmp.eq.s32.totalorder %v2149_v34, 1  ;;  %vm1003_vm5 = vcmp.eq.s32.totalorder %v2149_v34, 2 }
  0x4f   : > { %1472 = vmatmul.mubr.msk.f32.gmra.mrb[2].mxu0 %vm294_vm0, %v259_v14  ;;  %v1511_v61 = vsel %vm1217_vm7, 1.0, %v2952_v0  ;;  %v2209_v3 = vunpack.c.1.s8 %v276_v51  ;;  %v2211_v5 = vunpack.c.2.s8 %v276_v51  ;;  %v2213_v6 = vunpack.c.3.s8 %v276_v51  ;;  %p1791_p6 = pneg %p1790_p0 }
  0x50   : > { %1488 = vmatmul.mubr.msk.f32.gmra.mrb[2].mxu1 %vm294_vm0, %v259_v14  ;;  %419 = vmatprep.mubr.f32.mxu0 %v2952_v0  ;;  %v1314_v48 = vadd.f32 %v1508_v46, %v1313_v45  ;;  %v2215_v7 = vunpack.c.0.s8 %v277_v57  ;;  %v2221_v11 = vunpack.c.1.s8 %v277_v57  ;;  %v2223_v12 = vunpack.c.2.s8 %v277_v57 }
  0x51   : > { %580 = vmatprep.mubr.f32.mxu1 %v2952_v0  ;;  %p1798_p4 = pnand %p1797_p5, %p1791_p6 }
  0x52   : > { %v1315_v52 = vadd.f32 %v1509_v49, %v1314_v48  ;;  %2973 = vst [vmem:[#allocation11_spill] sm:$0xff] %v2221_v11  ;;  %2974 = vst [vmem:[#allocation12_spill] sm:$0xff] %v2223_v12 }
  0x53   : > { %1473 = vmatmul.mubr.msk.f32.gmra.mrb[4].mxu0 %vm294_vm0, %v260_v15 }
  0x54   : > { %1489 = vmatmul.mubr.msk.f32.gmra.mrb[4].mxu1 %vm294_vm0, %v260_v15  ;;  %425 = vmatprep.mubr.f32.mxu0 %v2952_v0  ;;  %v1316_v56 = vadd.f32 %v1510_v53, %v1315_v52 }
  0x55   : > { %586 = vmatprep.mubr.f32.mxu1 %v2952_v0 }
  0x56   : > { %v2219_v10 = vadd.f32 %v1511_v61, %v1316_v56 }
  0x57   : > { %1474 = vmatmul.mubr.msk.f32.gmra.mrb[6].mxu0 %vm294_vm0, %v261_v16 }
  0x58   : > { %1490 = vmatmul.mubr.msk.f32.gmra.mrb[6].mxu1 %vm294_vm0, %v261_v16  ;;  %431 = vmatprep.mubr.f32.mxu0 %v2952_v0  ;;  %2972 = vst [vmem:[#allocation10_spill] sm:$0xff] %v2219_v10 }
  0x59   : > { %592 = vmatprep.mubr.f32.mxu1 %v2952_v0 }
  0x5b   : > { %1475 = vmatmul.mubr.msk.f32.gmra.mrb[8].mxu0 %vm294_vm0, %v262_v17 }
  0x5c   : > { %1491 = vmatmul.mubr.msk.f32.gmra.mrb[8].mxu1 %vm294_vm0, %v262_v17  ;;  %437 = vmatprep.mubr.f32.mxu0 %v2952_v0 }
  0x5d   : > { %598 = vmatprep.mubr.f32.mxu1 %v2952_v0 }
  0x5f   : > { %1476 = vmatmul.mubr.msk.f32.gmra.mrb[10].mxu0 %vm294_vm0, %v263_v18 }
  0x60   : > { %1492 = vmatmul.mubr.msk.f32.gmra.mrb[10].mxu1 %vm294_vm0, %v263_v18  ;;  %443 = vmatprep.mubr.f32.mxu0 %v2952_v0 }
  0x61   : > { %604 = vmatprep.mubr.f32.mxu1 %v2952_v0 }
  0x63   : > { %1477 = vmatmul.mubr.msk.f32.gmra.mrb[12].mxu0 %vm294_vm0, %v264_v19 }
  0x64   : > { %1493 = vmatmul.mubr.msk.f32.gmra.mrb[12].mxu1 %vm294_vm0, %v264_v19  ;;  %449 = vmatprep.mubr.f32.mxu0 %v2952_v0 }
  0x65   : > { %610 = vmatprep.mubr.f32.mxu1 %v2952_v0 }
  0x67   : > { %1478 = vmatmul.mubr.msk.f32.gmra.mrb[14].mxu0 %vm294_vm0, %v265_v20 }
  0x68   : > { %1494 = vmatmul.mubr.msk.f32.gmra.mrb[14].mxu1 %vm294_vm0, %v265_v20  ;;  %455 = vmatprep.mubr.f32.mxu0 %v2952_v0 }
  0x69   : > { %616 = vmatprep.mubr.f32.mxu1 %v2952_v0 }
  0x6b   : > { %1479 = vmatmul.mubr.msk.f32.gmra.mrb[16].mxu0 %vm294_vm0, %v266_v21 }
  0x6c   : > { %1495 = vmatmul.mubr.msk.f32.gmra.mrb[16].mxu1 %vm294_vm0, %v266_v21  ;;  %461 = vmatprep.mubr.f32.mxu0 %v2952_v0 }
  0x6d   : > { %622 = vmatprep.mubr.f32.mxu1 %v2952_v0 }
  0x6f   : > { %1480 = vmatmul.mubr.msk.f32.gmra.mrb[18].mxu0 %vm294_vm0, %v267_v22 }
  0x70   : > { %1496 = vmatmul.mubr.msk.f32.gmra.mrb[18].mxu1 %vm294_vm0, %v267_v22  ;;  %467 = vmatprep.mubr.f32.mxu0 %v2952_v0 }
  0x71   : > { %628 = vmatprep.mubr.f32.mxu1 %v2952_v0 }
  0x73   : > { %1481 = vmatmul.mubr.msk.f32.gmra.mrb[20].mxu0 %vm294_vm0, %v268_v23 }
  0x74   : > { %1497 = vmatmul.mubr.msk.f32.gmra.mrb[20].mxu1 %vm294_vm0, %v268_v23  ;;  %473 = vmatprep.mubr.f32.mxu0 %v2952_v0 }
  0x75   : > { %634 = vmatprep.mubr.f32.mxu1 %v2952_v0 }
  0x77   : > { %1482 = vmatmul.mubr.msk.f32.gmra.mrb[22].mxu0 %vm294_vm0, %v269_v24 }
  0x78   : > { %1498 = vmatmul.mubr.msk.f32.gmra.mrb[22].mxu1 %vm294_vm0, %v269_v24  ;;  %479 = vmatprep.mubr.f32.mxu0 %v2952_v0 }
  0x79   : > { %640 = vmatprep.mubr.f32.mxu1 %v2952_v0 }
  0x7b   : > { %1483 = vmatmul.mubr.msk.f32.gmra.mrb[24].mxu0 %vm294_vm0, %v270_v25 }
  0x7c   : > { %1499 = vmatmul.mubr.msk.f32.gmra.mrb[24].mxu1 %vm294_vm0, %v270_v25  ;;  %485 = vmatprep.mubr.f32.mxu0 %v2952_v0 }
  0x7d   : > { %646 = vmatprep.mubr.f32.mxu1 %v2952_v0 }
  0x7f   : > { %1484 = vmatmul.mubr.msk.f32.gmra.mrb[26].mxu0 %vm294_vm0, %v271_v26 }
  0x80   : > { %1500 = vmatmul.mubr.msk.f32.gmra.mrb[26].mxu1 %vm294_vm0, %v271_v26  ;;  %491 = vmatprep.mubr.f32.mxu0 %v2952_v0  ;;  %v2247_v26 = vunpack.c.3.s8 %v277_v57 }
  0x81   : > { %652 = vmatprep.mubr.f32.mxu1 %v2952_v0 }
  0x82   : > { %2976 = vst [vmem:[#allocation14_spill] sm:$0xff] %v2247_v26 }
  0x83   : > { %1485 = vmatmul.mubr.msk.f32.gmra.mrb[28].mxu0 %vm294_vm0, %v272_v27 }
  0x84   : > { %1501 = vmatmul.mubr.msk.f32.gmra.mrb[28].mxu1 %vm294_vm0, %v272_v27  ;;  %497 = vmatprep.mubr.f32.mxu0 %v2952_v0 }
  0x85   : > { %658 = vmatprep.mubr.f32.mxu1 %v2952_v0 }
  0x87   : > { %1486 = vmatmul.mubr.msk.f32.gmra.mrb[30].mxu0 %vm294_vm0, %v273_v28 }
  0x88   : > { %1502 = vmatmul.mubr.msk.f32.gmra.mrb[30].mxu1 %vm294_vm0, %v273_v28  ;;  %vm1114_vm0 = vcmp.eq.s32.totalorder %v2139_v31, 3 }
 0x11e   : > { %v409_v55 = vpop.f32.mrb[0].mxu0 }
 0x11f   : > { %v793_v58 = vsel %vm777_vm9, %v409_v55, 0.0  ;;  %v411_v59 = vpop.f32.mrb[1].mxu0  ;;  %v570_v60 = vpop.f32.mrb[0].mxu1  ;;  %vm1218_vm9 = vcmp.ne.s32.totalorder %v2209_v3, 4294967295 }
 0x120   : > { %v665_v62 = vmax.f32 %v409_v55, %v411_v59  ;;  %v905_v63 = vsel %vm889_vm10, %v411_v59, 0.0  ;;  %v1017_v1 = vsel %vm1001_vm11, %v570_v60, 0.0  ;;  %v572_v2 = vpop.f32.mrb[1].mxu1  ;;  %vm1115_vm10 = vcmp.eq.s32.totalorder %v2149_v34, 3 }
 0x121   : > { %v921_v4 = vadd.f32 %v905_v63, %v793_v58  ;;  %v1129_v14 = vsel %vm1113_vm12, %v572_v2, 0.0  ;;  %vm780_vm11 = vcmp.eq.s32.totalorder %v2155_v37, 0  ;;  %v2245_v25 = vsel %vm1218_vm9, 1.0, %v2952_v0 }
 0x122   : > { %v681_v8 = vmax.f32 %v665_v62, %v570_v60  ;;  %v2217_v9 = vpop.f32.mrb[2].mxu0  ;;  %2975 = vst [vmem:[#allocation13_spill] sm:$0xff] %v2245_v25  ;;  %vm892_vm12 = vcmp.eq.s32.totalorder %v2155_v37, 1 }
 0x123   : > { %v1033_v13 = vadd.f32 %v1017_v1, %v921_v4  ;;  %v794_v15 = vsel %vm778_vm13, %v2217_v9, 0.0  ;;  %v417_v16 = vpop.f32.mrb[3].mxu0  ;;  %v576_v17 = vpop.f32.mrb[2].mxu1  ;;  %vm1004_vm13 = vcmp.eq.s32.totalorder %v2155_v37, 2 }
 0x124   : > { %v2231_v18 = vmax.f32 %v681_v8, %v572_v2  ;;  %v666_v19 = vmax.f32 %v2217_v9, %v417_v16  ;;  %v906_v20 = vsel %vm890_vm14, %v417_v16, 0.0  ;;  %v1018_v21 = vsel %vm1002_vm15, %v576_v17, 0.0  ;;  %v578_v22 = vpop.f32.mrb[3].mxu1 }
 0x125   : > { %v2240_v23 = vadd.f32 %v1129_v14, %v1033_v13  ;;  %v922_v24 = vadd.f32 %v906_v20, %v794_v15  ;;  %v1130_v38 = vsel %vm1114_vm0, %v578_v22, 0.0  ;;  %vm1116_vm14 = vcmp.eq.s32.totalorder %v2155_v37, 3 }
 0x126   : > { %v713_v27 = vsub.f32 %v409_v55, %v2231_v18  ;;  %v825_v28 = vsub.f32 %v411_v59, %v2231_v18  ;;  %v937_v29 = vsub.f32 %v570_v60, %v2231_v18  ;;  %v1049_v32 = vsub.f32 %v572_v2, %v2231_v18  ;;  %v421_v33 = vpop.f32.mrb[4].mxu0 }
 0x127   : > { %v682_v35 = vmax.f32 %v666_v19, %v576_v17  ;;  %v1034_v36 = vadd.f32 %v1018_v21, %v922_v24  ;;  %v795_v39 = vsel %vm779_vm8, %v421_v33, 0.0  ;;  %v423_v40 = vpop.f32.mrb[5].mxu0  ;;  %v582_v42 = vpop.f32.mrb[4].mxu1  ;;  %vm781_vm15 = vcmp.eq.s32.totalorder %v2162_v41, 0 }
 0x128   : > { %v729_v43 = vmul.f32 1.442695, %v713_v27  ;;  %v841_v45 = vmul.f32 1.442695, %v825_v28  ;;  %v953_v46 = vmul.f32 1.442695, %v937_v29  ;;  %v667_v48 = vmax.f32 %v421_v33, %v423_v40 }
 0x129   : > { %v1065_v49 = vmul.f32 1.442695, %v1049_v32  ;;  %v2261_v51 = vmax.f32 %v682_v35, %v578_v22  ;;  %v2263_v52 = vadd.f32 %v1130_v38, %v1034_v36  ;;  %v907_v53 = vsel %vm891_vm6, %v423_v40, 0.0  ;;  %v584_v55 = vpop.f32.mrb[5].mxu1 }
 0x12a   : > { %vm893_vm8 = vcmp.eq.s32.totalorder %v2162_v41, 1  ;;  %vm1005_vm0 = vcmp.eq.s32.totalorder %v2162_v41, 2  ;;  %1598 = vpow2.f32 %v729_v43  ;;  %v923_v56 = vadd.f32 %v907_v53, %v795_v39  ;;  %v2271_v59 = vpop.f32.mrb[6].mxu0 }
 0x12b   : > { %v683_v57 = vmax.f32 %v667_v48, %v582_v42  ;;  %v1019_v58 = vsel %vm1003_vm5, %v582_v42, 0.0  ;;  %1600 = vpow2.f32 %v841_v45  ;;  %v714_v60 = vsub.f32 %v2217_v9, %v2261_v51  ;;  %v2277_v63 = vpop.f32.mrb[7].mxu0  ;;  %v2279_v1 = vpop.f32.mrb[6].mxu1 }
 0x12c   : > { %v826_v61 = vsub.f32 %v417_v16, %v2261_v51  ;;  %v938_v62 = vsub.f32 %v576_v17, %v2261_v51  ;;  %vm1117_vm6 = vcmp.eq.s32.totalorder %v2162_v41, 3  ;;  %1602 = vpow2.f32 %v953_v46  ;;  %v2285_v13 = vpop.f32.mrb[7].mxu1 }
 0x12d   : > { %v1050_v2 = vsub.f32 %v578_v22, %v2261_v51  ;;  %v1035_v4 = vadd.f32 %v1019_v58, %v923_v56  ;;  %v2283_v8 = vmax.f32 %v683_v57, %v584_v55  ;;  %1604 = vpow2.f32 %v1065_v49 }
 0x12e   : > { %v731_v9 = vmul.f32 1.442695, %v714_v60  ;;  %v843_v14 = vmul.f32 1.442695, %v826_v61  ;;  %v955_v15 = vmul.f32 1.442695, %v938_v62  ;;  %v668_v39 = vmax.f32 %v2271_v59, %v2277_v63 }
 0x12f   : > { %v1067_v16 = vmul.f32 1.442695, %v1050_v2  ;;  %v715_v17 = vsub.f32 %v421_v33, %v2283_v8  ;;  %v827_v19 = vsub.f32 %v423_v40, %v2283_v8  ;;  %v939_v20 = vsub.f32 %v582_v42, %v2283_v8  ;;  %v2290_v21 = vpop.f32.mrb[8].mxu0  ;;  %v2300_v29 = vpop.f32.mrb[8].mxu1 }
 0x130   : > { %1606 = vpow2.f32 %v731_v9  ;;  %v1051_v22 = vsub.f32 %v584_v55, %v2283_v8  ;;  %v1131_v24 = vsel %vm1115_vm10, %v584_v55, 0.0  ;;  %v796_v27 = vsel %vm780_vm11, %v2271_v59, 0.0  ;;  %v2298_v28 = vpop.f32.mrb[9].mxu0  ;;  %v2306_v40 = vpop.f32.mrb[9].mxu1 }
 0x131   : > { %1608 = vpow2.f32 %v843_v14  ;;  %v733_v32 = vmul.f32 1.442695, %v715_v17  ;;  %v845_v33 = vmul.f32 1.442695, %v827_v19  ;;  %v957_v35 = vmul.f32 1.442695, %v939_v20 }
 0x132   : > { %1610 = vpow2.f32 %v955_v15  ;;  %v1069_v36 = vmul.f32 1.442695, %v1051_v22  ;;  %v2302_v38 = vadd.f32 %v1131_v24, %v1035_v4  ;;  %v908_v42 = vsel %vm892_vm12, %v2277_v63, 0.0  ;;  %v2317_v46 = vpop.f32.mrb[10].mxu0 }
 0x133   : > { %1612 = vpow2.f32 %v1067_v16  ;;  %v1020_v43 = vsel %vm1004_vm13, %v2279_v1, 0.0  ;;  %v1132_v45 = vsel %vm1116_vm14, %v2285_v13, 0.0  ;;  %v924_v48 = vadd.f32 %v908_v42, %v796_v27  ;;  %v2324_v55 = vpop.f32.mrb[11].mxu0  ;;  %v2327_v56 = vpop.f32.mrb[10].mxu1 }
 0x134   : > { %1614 = vpow2.f32 %v733_v32  ;;  %v684_v49 = vmax.f32 %v668_v39, %v2279_v1  ;;  %v797_v53 = vsel %vm781_vm15, %v2290_v21, 0.0  ;;  %vm782_vm5 = vcmp.eq.s32.totalorder %v2168_v44, 0  ;;  %v1599_v57 = vpop.eup %1598  ;;  %v2337_v62 = vpop.f32.mrb[11].mxu1 }
 0x135   : > { %vm894_vm10 = vcmp.eq.s32.totalorder %v2168_v44, 1  ;;  %1616 = vpow2.f32 %v845_v33  ;;  %v669_v58 = vmax.f32 %v2290_v21, %v2298_v28  ;;  %v909_v60 = vsel %vm893_vm8, %v2298_v28, 0.0  ;;  %v1601_v2 = vpop.eup %1600 }
 0x136   : > { %v1021_v61 = vsel %vm1005_vm0, %v2300_v29, 0.0  ;;  %1618 = vpow2.f32 %v957_v35  ;;  %v1036_v4 = vadd.f32 %v1020_v43, %v924_v48  ;;  %v2340_v9 = vmax.f32 %v684_v49, %v2285_v13  ;;  %v1603_v15 = vpop.eup %1602  ;;  %v2348_v20 = vpop.f32.mrb[12].mxu0 }
 0x137   : > { %v925_v14 = vadd.f32 %v909_v60, %v797_v53  ;;  %vm1006_vm11 = vcmp.eq.s32.totalorder %v2168_v44, 2  ;;  %vm1118_vm12 = vcmp.eq.s32.totalorder %v2168_v44, 3  ;;  %v873_v16 = vadd.f32 %v1601_v2, %v1599_v57  ;;  %v1605_v22 = vpop.eup %1604  ;;  %v2359_v35 = vpop.f32.mrb[13].mxu0 }
 0x138   : > { %1620 = vpow2.f32 %v1069_v36  ;;  %v685_v17 = vmax.f32 %v669_v58, %v2300_v29  ;;  %v1133_v19 = vsel %vm1117_vm6, %v2306_v40, 0.0  ;;  %vm783_vm13 = vcmp.eq.s32.totalorder %v2174_v47, 0  ;;  %v2361_v36 = vpop.f32.mrb[12].mxu1 }
 0x139   : > { %v716_v24 = vsub.f32 %v2271_v59, %v2340_v9  ;;  %v828_v27 = vsub.f32 %v2277_v63, %v2340_v9  ;;  %v940_v32 = vsub.f32 %v2279_v1, %v2340_v9  ;;  %v1052_v33 = vsub.f32 %v2285_v13, %v2340_v9  ;;  %v2368_v59 = vpop.f32.mrb[13].mxu1 }
 0x13a   : > { %v985_v39 = vadd.f32 %v1603_v15, %v873_v16  ;;  %v2363_v42 = vadd.f32 %v1132_v45, %v1036_v4  ;;  %v1037_v43 = vadd.f32 %v1021_v61, %v925_v14  ;;  %v2366_v48 = vmax.f32 %v685_v17, %v2306_v40  ;;  %v1607_v63 = vpop.eup %1606  ;;  %v2377_v2 = vpop.f32.mrb[14].mxu0 }
 0x13b   : > { %v735_v49 = vmul.f32 1.442695, %v716_v24  ;;  %v847_v53 = vmul.f32 1.442695, %v828_v27  ;;  %v959_v1 = vmul.f32 1.442695, %v940_v32  ;;  %v670_v13 = vmax.f32 %v2317_v46, %v2324_v55  ;;  %v1609_v57 = vpop.eup %1608 }
 0x13c   : > { %v1097_v58 = vadd.f32 %v1605_v22, %v985_v39  ;;  %v1071_v60 = vmul.f32 1.442695, %v1052_v33  ;;  %v717_v45 = vsub.f32 %v2290_v21, %v2366_v48  ;;  %v829_v61 = vsub.f32 %v2298_v28, %v2366_v48  ;;  %v1611_v4 = vpop.eup %1610  ;;  %v2385_v21 = vpop.f32.mrb[15].mxu0 }
 0x13d   : > { %vm895_vm14 = vcmp.eq.s32.totalorder %v2174_v47, 1  ;;  %v874_v14 = vadd.f32 %v1609_v57, %v1607_v63  ;;  %1622 = vpow2.f32 %v735_v49  ;;  %v941_v15 = vsub.f32 %v2300_v29, %v2366_v48  ;;  %v2387_v28 = vpop.f32.mrb[14].mxu1  ;;  %v1613_v17 = vpop.eup %1612 }
 0x13e   : > { %v1053_v16 = vsub.f32 %v2306_v40, %v2366_v48  ;;  %vm1007_vm15 = vcmp.eq.s32.totalorder %v2174_v47, 2  ;;  %vm1119_vm8 = vcmp.eq.s32.totalorder %v2174_v47, 3  ;;  %1624 = vlog2.f32 %v1097_v58  ;;  %v2392_v29 = vpop.f32.mrb[15].mxu1  ;;  %v1615_v32 = vpop.eup %1614 }
 0x13f   : > { %v737_v22 = vmul.f32 1.442695, %v717_v45  ;;  %v849_v24 = vmul.f32 1.442695, %v829_v61  ;;  %v2389_v27 = vadd.f32 %v1133_v19, %v1037_v43  ;;  %vm784_vm0 = vcmp.eq.s32.totalorder %v2180_v50, 0  ;;  %v1617_v63 = vpop.eup %1616  ;;  %v2402_v57 = vpop.f32.mrb[16].mxu0 }
 0x140   : > { %v986_v40 = vadd.f32 %v1611_v4, %v874_v14  ;;  %1626 = vpow2.f32 %v847_v53  ;;  %v961_v33 = vmul.f32 1.442695, %v941_v15  ;;  %v1073_v39 = vmul.f32 1.442695, %v1053_v16  ;;  %v1619_v58 = vpop.eup %1618  ;;  %v2406_v4 = vpop.f32.mrb[16].mxu1 }
 0x141   : > { %1628 = vpow2.f32 %v959_v1  ;;  %v798_v49 = vsel %vm782_vm5, %v2317_v46, 0.0  ;;  %v910_v19 = vsel %vm894_vm10, %v2324_v55, 0.0  ;;  %v686_v43 = vmax.f32 %v670_v13, %v2327_v56  ;;  %v2404_v1 = vpop.f32.mrb[17].mxu0 }
 0x142   : > { %vm896_vm6 = vcmp.eq.s32.totalorder %v2180_v50, 1  ;;  %v1098_v53 = vadd.f32 %v1613_v17, %v986_v40  ;;  %v875_v45 = vadd.f32 %v1617_v63, %v1615_v32  ;;  %1630 = vpow2.f32 %v1071_v60  ;;  %v1621_v14 = vpop.eup %1620  ;;  %v2417_v17 = vpop.f32.mrb[17].mxu1 }
 0x143   : > { %v926_v61 = vadd.f32 %v910_v19, %v798_v49  ;;  %1632 = vpow2.f32 %v737_v22  ;;  %v1022_v15 = vsel %vm1006_vm11, %v2327_v56, 0.0  ;;  %v2412_v13 = vmax.f32 %v686_v43, %v2337_v62  ;;  %v2429_v19 = vpop.f32.mrb[18].mxu0 }
 0x144   : > { %v1134_v16 = vsel %vm1118_vm12, %v2337_v62, 0.0  ;;  %1634 = vlog2.f32 %v1098_v53  ;;  %v987_v60 = vadd.f32 %v1619_v58, %v875_v45  ;;  %v799_v22 = vsel %vm783_vm13, %v2348_v20, 0.0  ;;  %v2435_v45 = vpop.f32.mrb[19].mxu0 }
 0x145   : > { %v1038_v32 = vadd.f32 %v1022_v15, %v926_v61  ;;  %vm1008_vm5 = vcmp.eq.s32.totalorder %v2180_v50, 2  ;;  %1636 = vpow2.f32 %v849_v24  ;;  %v718_v40 = vsub.f32 %v2317_v46, %v2412_v13  ;;  %v2437_v24 = vpop.f32.mrb[18].mxu1 }
 0x146   : > { %v830_v63 = vsub.f32 %v2324_v55, %v2412_v13  ;;  %v942_v49 = vsub.f32 %v2327_v56, %v2412_v13  ;;  %v1099_v43 = vadd.f32 %v1621_v14, %v987_v60  ;;  %1638 = vpow2.f32 %v961_v33  ;;  %v2445_v33 = vpop.f32.mrb[19].mxu1 }
 0x147   : > { %v1054_v58 = vsub.f32 %v2337_v62, %v2412_v13  ;;  %v2433_v53 = vadd.f32 %v1134_v16, %v1038_v32  ;;  %1640 = vpow2.f32 %v1073_v39  ;;  %v739_v46 = vmul.f32 1.442695, %v718_v40  ;;  %v1623_v15 = vpop.eup %1622  ;;  %v2453_v40 = vpop.f32.mrb[20].mxu0 }
 0x148   : > { %v851_v61 = vmul.f32 1.442695, %v830_v63  ;;  %v963_v55 = vmul.f32 1.442695, %v942_v49  ;;  %1642 = vlog2.f32 %v1099_v43  ;;  %v671_v14 = vmax.f32 %v2348_v20, %v2359_v35  ;;  %v1625_v16 = vpop.eup %1624 }
 0x149   : > { %v1075_v56 = vmul.f32 1.442695, %v1054_v58  ;;  %v911_v62 = vsel %vm895_vm14, %v2359_v35, 0.0  ;;  %vm1120_vm10 = vcmp.eq.s32.totalorder %v2180_v50, 3  ;;  %1644 = vpow2.f32 %v739_v46  ;;  %v2461_v46 = vpop.f32.mrb[20].mxu1 }
 0x14a   : > { %v927_v39 = vadd.f32 %v911_v62, %v799_v22  ;;  %v1023_v60 = vsel %vm1007_vm15, %v2361_v36, 0.0  ;;  %v1135_v32 = vsel %vm1119_vm8, %v2368_v59, 0.0  ;;  %v1627_v63 = vpop.eup %1626  ;;  %v1162_v49 = vmul.f32 0.6931472, %v1625_v16  ;;  %v2459_v22 = vpop.f32.mrb[21].mxu0 }
 0x14b   : > { %1646 = vpow2.f32 %v851_v61  ;;  %v687_v43 = vmax.f32 %v671_v14, %v2361_v36  ;;  %v800_v58 = vsel %vm784_vm0, %v2377_v2, 0.0  ;;  %v1629_v62 = vpop.eup %1628  ;;  %v876_v0 = vadd.f32 %v1627_v63, %v1623_v15  ;;  %v2465_v26 = vpop.f32.mrb[21].mxu1 }
 0x14c   : > { %1648 = vpow2.f32 %v963_v55  ;;  %v1039_v25 = vadd.f32 %v1023_v60, %v927_v39  ;;  %v672_v10 = vmax.f32 %v2377_v2, %v2385_v21  ;;  %v1631_v61 = vpop.eup %1630  ;;  %v1193_v14 = vadd.f32 %v1162_v49, %v2231_v18  ;;  %v2478_v63 = vpop.f32.mrb[22].mxu0 }
 0x14d   : > { %1650 = vpow2.f32 %v1075_v56  ;;  %v2469_v16 = vmax.f32 %v687_v43, %v2368_v59  ;;  %v912_v12 = vsel %vm896_vm6, %v2385_v21, 0.0  ;;  %v1633_v47 = vpop.eup %1632  ;;  %v988_v15 = vadd.f32 %v1629_v62, %v876_v0 }
 0x14e   : > { %v2474_v55 = vadd.f32 %v1135_v32, %v1039_v25  ;;  %v928_v39 = vadd.f32 %v912_v12, %v800_v58  ;;  %v688_v60 = vmax.f32 %v672_v10, %v2387_v28  ;;  %vm785_vm11 = vcmp.eq.s32.totalorder %v2190_v54, 0  ;;  %v1635_v18 = vpop.eup %1634  ;;  %v2487_v25 = vpop.f32.mrb[23].mxu0 }
 0x14f   : > { %2977 = vst [vmem:[#allocation15_spill] sm:$0xff] %v2469_v16  ;;  %v1225_v56 = vsub.f32 %v1193_v14, %v2240_v23  ;;  %v719_v49 = vsub.f32 %v2348_v20, %v2469_v16  ;;  %v831_v43 = vsub.f32 %v2359_v35, %v2469_v16  ;;  %v943_v0 = vsub.f32 %v2361_v36, %v2469_v16  ;;  %v2489_v12 = vpop.f32.mrb[22].mxu1  ;;  %v1637_v10 = vpop.eup %1636 }
 0x150   : > { %2978 = vst [vmem:[#allocation16_spill] sm:$0xff] %v2474_v55  ;;  %v1164_v32 = vmul.f32 0.6931472, %v1635_v18  ;;  %v1100_v58 = vadd.f32 %v1631_v61, %v988_v15  ;;  %v1055_v62 = vsub.f32 %v2368_v59, %v2469_v16  ;;  %v1024_v23 = vsel %vm1008_vm5, %v2387_v28, 0.0  ;;  %v2497_v20 = vpop.f32.mrb[23].mxu1  ;;  %v1639_v35 = vpop.eup %1638 }
 0x151   : > { %vm897_vm12 = vcmp.eq.s32.totalorder %v2190_v54, 1  ;;  %2979 = vst [vmem:[#allocation17_spill] sm:$0xff] %v2497_v20  ;;  %v1241_v36 = vsel %vm1209_vm1, %v1225_v56, 0.0  ;;  %v877_v14 = vadd.f32 %v1637_v10, %v1633_v47  ;;  %v741_v55 = vmul.f32 1.442695, %v719_v49  ;;  %v1641_v59 = vpop.eup %1640  ;;  %v2505_v20 = vpop.f32.mrb[24].mxu0 }
 0x152   : > { %v853_v11 = vmul.f32 1.442695, %v831_v43  ;;  %vm1009_vm13 = vcmp.eq.s32.totalorder %v2190_v54, 2  ;;  %vm1121_vm14 = vcmp.eq.s32.totalorder %v2190_v54, 3  ;;  %v1194_v61 = vadd.f32 %v1164_v32, %v2261_v51  ;;  %v1643_v16 = vpop.eup %1642  ;;  %v2511_v49 = vpop.f32.mrb[25].mxu0 }
 0x153   : > { %1652 = vlog2.f32 %v1100_v58  ;;  %v965_v15 = vmul.f32 1.442695, %v943_v0  ;;  %v1077_v18 = vmul.f32 1.442695, %v1055_v62  ;;  %vm786_vm15 = vcmp.eq.s32.totalorder %v2209_v3, 0  ;;  %v2513_v43 = vpop.f32.mrb[24].mxu1  ;;  %v1645_v51 = vpop.eup %1644 }
 0x154   : > { %v989_v30 = vadd.f32 %v1639_v35, %v877_v14  ;;  %1654 = vpow2.f32 %v741_v55  ;;  %v1040_v47 = vadd.f32 %v1024_v23, %v928_v39  ;;  %v2508_v56 = vmax.f32 %v688_v60, %v2392_v29  ;;  %v2519_v55 = vpop.f32.mrb[25].mxu1  ;;  %v2528_v35 = vpop.f32.mrb[26].mxu0 }
 0x155   : > { %vm898_vm1 = vcmp.eq.s32.totalorder %v2209_v3, 1  ;;  %v1226_v0 = vsub.f32 %v1194_v61, %v2263_v52  ;;  %v1166_v10 = vmul.f32 0.6931472, %v1643_v16  ;;  %1656 = vpow2.f32 %v853_v11  ;;  %v1647_v39 = vpop.eup %1646 }
 0x156   : > { %v1136_v32 = vsel %vm1120_vm10, %v2392_v29, 0.0  ;;  %v1101_v60 = vadd.f32 %v1641_v59, %v989_v30  ;;  %1658 = vpow2.f32 %v965_v15  ;;  %v720_v58 = vsub.f32 %v2377_v2, %v2508_v56  ;;  %v1649_v23 = vpop.eup %1648  ;;  %v2530_v30 = vpop.f32.mrb[27].mxu0 }
 0x157   : > { %v832_v62 = vsub.f32 %v2385_v21, %v2508_v56  ;;  %v1242_v52 = vsel %vm1210_vm2, %v1226_v0, 0.0  ;;  %v1195_v11 = vadd.f32 %v1166_v10, %v2283_v8  ;;  %v878_v16 = vadd.f32 %v1647_v39, %v1645_v51  ;;  %v1651_v14 = vpop.eup %1650  ;;  %v2532_v2 = vpop.f32.mrb[26].mxu1 }
 0x158   : > { %1660 = vpow2.f32 %v1077_v18  ;;  %v1257_v61 = vadd.f32 %v1242_v52, %v1241_v36  ;;  %v743_v59 = vmul.f32 1.442695, %v720_v58  ;;  %v944_v31 = vsub.f32 %v2387_v28, %v2508_v56  ;;  %v2540_v18 = vpop.f32.mrb[27].mxu1  ;;  %v2552_v10 = vpop.f32.mrb[28].mxu0 }
 0x159   : > { %1662 = vlog2.f32 %v1101_v60  ;;  %v855_v15 = vmul.f32 1.442695, %v832_v62  ;;  %v1227_v21 = vsub.f32 %v1195_v11, %v2302_v38  ;;  %v990_v50 = vadd.f32 %v1649_v23, %v878_v16  ;;  %v2559_v58 = vpop.f32.mrb[29].mxu0  ;;  %v2561_v34 = vpop.f32.mrb[28].mxu1 }
 0x15a   : > { %v1056_v8 = vsub.f32 %v2392_v29, %v2508_v56  ;;  %vm1010_vm2 = vcmp.eq.s32.totalorder %v2209_v3, 2  ;;  %1664 = vpow2.f32 %v743_v59  ;;  %v2542_v36 = vadd.f32 %v1136_v32, %v1040_v47  ;;  %v2569_v11 = vpop.f32.mrb[29].mxu1 }
 0x15b   : > { %v801_v51 = vsel %vm785_vm11, %v2402_v57, 0.0  ;;  %v673_v38 = vmax.f32 %v2402_v57, %v2404_v1  ;;  %v1243_v28 = vsel %vm1211_vm3, %v1227_v21, 0.0  ;;  %v1102_v0 = vadd.f32 %v1651_v14, %v990_v50 }
 0x15c   : > { %1666 = vpow2.f32 %v855_v15  ;;  %v967_v29 = vmul.f32 1.442695, %v944_v31  ;;  %vm1122_vm8 = vcmp.eq.s32.totalorder %v2209_v3, 3  ;;  %v1258_v39 = vadd.f32 %v1257_v61, %v1243_v28 }
 0x15d   : > { %v1079_v47 = vmul.f32 1.442695, %v1056_v8  ;;  %v913_v32 = vsel %vm897_vm12, %v2404_v1, 0.0  ;;  %v689_v60 = vmax.f32 %v673_v38, %v2406_v4  ;;  %vm787_vm0 = vcmp.eq.s32.totalorder %v2211_v5, 0  ;;  %v1653_v50 = vpop.eup %1652 }
 0x15e   : > { %1668 = vlog2.f32 %v1102_v0  ;;  %v929_v62 = vadd.f32 %v913_v32, %v801_v51  ;;  %v1025_v23 = vsel %vm1009_vm13, %v2406_v4, 0.0  ;;  %v1137_v52 = vsel %vm1121_vm14, %v2417_v17, 0.0  ;;  %v1655_v16 = vpop.eup %1654  ;;  %v2582_v51 = vpop.f32.mrb[30].mxu0 }
 0x15f   : > { %v1168_v14 = vmul.f32 0.6931472, %v1653_v50  ;;  %1670 = vpow2.f32 %v967_v29  ;;  %v2572_v61 = vmax.f32 %v689_v60, %v2417_v17  ;;  %v802_v59 = vsel %vm786_vm15, %v2429_v19, 0.0  ;;  %v1657_v15 = vpop.eup %1656  ;;  %2980 = vst [vmem:[#allocation18_spill] sm:$0xff] %v2582_v51  ;;  %v2589_v32 = vpop.f32.mrb[31].mxu0 }
 0x160   : > { %1672 = vpow2.f32 %v1079_v47  ;;  %v1041_v21 = vadd.f32 %v1025_v23, %v929_v62  ;;  %v674_v31 = vmax.f32 %v2429_v19, %v2435_v45  ;;  %v914_v8 = vsel %vm898_vm1, %v2435_v45, 0.0  ;;  %v1659_v38 = vpop.eup %1658  ;;  %2981 = vst [vmem:[#allocation19_spill] sm:$0xff] %v2589_v32  ;;  %v2591_v60 = vpop.f32.mrb[30].mxu1 }
 0x161   : > { %v1196_v28 = vadd.f32 %v1168_v14, %v2340_v9  ;;  %v879_v0 = vadd.f32 %v1657_v15, %v1655_v16  ;;  %v721_v29 = vsub.f32 %v2402_v57, %v2572_v61  ;;  %v833_v47 = vsub.f32 %v2404_v1, %v2572_v61  ;;  %2982 = vst [vmem:[#allocation20_spill] sm:$0xff] %v2591_v60  ;;  %v2601_v57 = vpop.f32.mrb[31].mxu1 }
 0x162   : > { %v1661_v50 = vpop.eup %1660  ;;  %v945_v62 = vsub.f32 %v2406_v4, %v2572_v61  ;;  %v1057_v23 = vsub.f32 %v2417_v17, %v2572_v61  ;;  %v2597_v51 = vadd.f32 %v1137_v52, %v1041_v21  ;;  %v930_v9 = vadd.f32 %v914_v8, %v802_v59 }
 0x163   : > { %vm899_vm3 = vcmp.eq.s32.totalorder %v2211_v5, 1  ;;  %vm1011_vm6 = vcmp.eq.s32.totalorder %v2211_v5, 2  ;;  %v1663_v1 = vpop.eup %1662  ;;  %v1228_v16 = vsub.f32 %v1196_v28, %v2363_v42  ;;  %v991_v14 = vadd.f32 %v1659_v38, %v879_v0 }
 0x164   : > { %v745_v15 = vmul.f32 1.442695, %v721_v29  ;;  %v857_v60 = vmul.f32 1.442695, %v833_v47  ;;  %vm1123_vm5 = vcmp.eq.s32.totalorder %v2211_v5, 3  ;;  %v690_v52 = vmax.f32 %v674_v31, %v2437_v24  ;;  %v1665_v59 = vpop.eup %1664 }
 0x165   : > { %v1170_v4 = vmul.f32 0.6931472, %v1663_v1  ;;  %v969_v32 = vmul.f32 1.442695, %v945_v62  ;;  %v1081_v17 = vmul.f32 1.442695, %v1057_v23  ;;  %v1103_v8 = vadd.f32 %v1661_v50, %v991_v14 }
 0x166   : > { %vm788_vm10 = vcmp.eq.s32.totalorder %v2213_v6, 0  ;;  %v1244_v21 = vsel %vm1212_vm4, %v1228_v16, 0.0  ;;  %1674 = vpow2.f32 %v745_v15  ;;  %v1026_v42 = vsel %vm1010_vm2, %v2437_v24, 0.0  ;;  %v1667_v38 = vpop.eup %1666 }
 0x167   : > { %v1259_v28 = vadd.f32 %v1258_v39, %v1244_v21  ;;  %v1197_v0 = vadd.f32 %v1170_v4, %v2366_v48  ;;  %1676 = vpow2.f32 %v857_v60  ;;  %v1042_v29 = vadd.f32 %v1026_v42, %v930_v9 }
 0x168   : > { %vm900_vm11 = vcmp.eq.s32.totalorder %v2213_v6, 1  ;;  %1678 = vlog2.f32 %v1103_v8  ;;  %v880_v31 = vadd.f32 %v1667_v38, %v1665_v59  ;;  %v2615_v47 = vmax.f32 %v690_v52, %v2445_v33  ;;  %v1669_v50 = vpop.eup %1668 }
 0x169   : > { %v1138_v37 = vsel %vm1122_vm8, %v2445_v33, 0.0  ;;  %v1229_v62 = vsub.f32 %v1197_v0, %v2389_v27  ;;  %1680 = vpow2.f32 %v969_v32  ;;  %v803_v48 = vsel %vm787_vm0, %v2453_v40, 0.0  ;;  %v1671_v60 = vpop.eup %1670 }
 0x16a   : > { %v2621_v39 = vadd.f32 %v1138_v37, %v1042_v29  ;;  %v1172_v23 = vmul.f32 0.6931472, %v1669_v50  ;;  %1682 = vpow2.f32 %v1081_v17  ;;  %v722_v9 = vsub.f32 %v2429_v19, %v2615_v47  ;;  %v1673_v16 = vpop.eup %1672 }
 0x16b   : > { %v834_v1 = vsub.f32 %v2435_v45, %v2615_v47  ;;  %vm2983_vm4 = vcmp.ne.s32.totalorder %v2162_v41, 4294967295  ;;  %v992_v32 = vadd.f32 %v1671_v60, %v880_v31  ;;  %v946_v14 = vsub.f32 %v2437_v24, %v2615_v47 }
 0x16c   : > { %v1245_v27 = vsel %vm2983_vm4, %v1229_v62, 0.0  ;;  %v1058_v15 = vsub.f32 %v2445_v33, %v2615_v47  ;;  %vm1012_vm12 = vcmp.eq.s32.totalorder %v2213_v6, 2  ;;  %v1198_v17 = vadd.f32 %v1172_v23, %v2412_v13 }
 0x16d   : > { %v1260_v4 = vadd.f32 %v1259_v28, %v1245_v27  ;;  %v747_v19 = vmul.f32 1.442695, %v722_v9  ;;  %v859_v52 = vmul.f32 1.442695, %v834_v1  ;;  %vm1124_vm13 = vcmp.eq.s32.totalorder %v2213_v6, 3 }
 0x16e   : > { %v1104_v45 = vadd.f32 %v1673_v16, %v992_v32  ;;  %v971_v59 = vmul.f32 1.442695, %v946_v14  ;;  %v1083_v41 = vmul.f32 1.442695, %v1058_v15  ;;  %v675_v21 = vmax.f32 %v2453_v40, %v2459_v22 }
 0x16f   : > { %v1230_v24 = vsub.f32 %v1198_v17, %v2433_v53  ;;  %1684 = vpow2.f32 %v747_v19  ;;  %v915_v33 = vsel %vm899_vm3, %v2459_v22, 0.0  ;;  %v1027_v13 = vsel %vm1011_vm6, %v2461_v46, 0.0 }
 0x170   : > { %1686 = vlog2.f32 %v1104_v45  ;;  %v931_v8 = vadd.f32 %v915_v33, %v803_v48  ;;  %v691_v42 = vmax.f32 %v675_v21, %v2461_v46  ;;  %v1139_v38 = vsel %vm1123_vm5, %v2465_v26, 0.0  ;;  %v1675_v28 = vpop.eup %1674  ;;  %v2987_v33 = vld [vmem:[#allocation17_spill] sm:$0xff] }
 0x171   : > { %vm2984_vm14 = vcmp.ne.s32.totalorder %v2168_v44, 4294967295  ;;  %1688 = vpow2.f32 %v859_v52  ;;  %v804_v0 = vsel %vm788_vm10, %v2478_v63, 0.0  ;;  %v676_v29 = vmax.f32 %v2478_v63, %v2487_v25  ;;  %v1677_v31 = vpop.eup %1676  ;;  %v2985_v52 = vld [vmem:[#allocation15_spill] sm:$0xff] }
 0x172   : > { %v1246_v53 = vsel %vm2984_vm14, %v1230_v24, 0.0  ;;  %1690 = vpow2.f32 %v971_v59  ;;  %v1043_v50 = vadd.f32 %v1027_v13, %v931_v8  ;;  %v2660_v62 = vmax.f32 %v691_v42, %v2465_v26  ;;  %v1679_v48 = vpop.eup %1678  ;;  %v2988_v13 = vld [vmem:[#allocation16_spill] sm:$0xff] }
 0x173   : > { %v1261_v37 = vadd.f32 %v1260_v4, %v1246_v53  ;;  %vm789_vm15 = vcmp.eq.s32.totalorder %v2215_v7, 0  ;;  %v881_v44 = vadd.f32 %v1677_v31, %v1675_v28  ;;  %1692 = vpow2.f32 %v1083_v41  ;;  %v1681_v9 = vpop.eup %1680  ;;  %v2986_v41 = vld [vmem:[#allocation11_spill] sm:$0xff] }
 0x174   : > { %v916_v60 = vsel %vm900_vm11, %v2487_v25, 0.0  ;;  %v692_v23 = vmax.f32 %v676_v29, %v2489_v12  ;;  %vm901_vm1 = vcmp.eq.s32.totalorder %v2215_v7, 1  ;;  %v1174_v1 = vmul.f32 0.6931472, %v1679_v48  ;;  %v1683_v14 = vpop.eup %1682 }
 0x175   : > { %v723_v16 = vsub.f32 %v2453_v40, %v2660_v62  ;;  %v835_v27 = vsub.f32 %v2459_v22, %v2660_v62  ;;  %v947_v32 = vsub.f32 %v2461_v46, %v2660_v62  ;;  %vm1013_vm2 = vcmp.eq.s32.totalorder %v2215_v7, 2 }
 0x176   : > { %v993_v15 = vadd.f32 %v1681_v9, %v881_v44  ;;  %v1059_v4 = vsub.f32 %v2465_v26, %v2660_v62  ;;  %v2677_v17 = vadd.f32 %v1139_v38, %v1043_v50  ;;  %v932_v19 = vadd.f32 %v916_v60, %v804_v0  ;;  %v2989_v50 = vld [vmem:[#allocation8_spill] sm:$0xff] }
 0x177   : > { %vm1125_vm8 = vcmp.eq.s32.totalorder %v2215_v7, 3  ;;  %v1199_v40 = vadd.f32 %v1174_v1, %v2985_v52  ;;  %v749_v45 = vmul.f32 1.442695, %v723_v16  ;;  %v861_v59 = vmul.f32 1.442695, %v835_v27 }
 0x178   : > { %v973_v22 = vmul.f32 1.442695, %v947_v32  ;;  %vm790_vm0 = vcmp.eq.s32.totalorder %v2986_v41, 0  ;;  %v1105_v46 = vadd.f32 %v1683_v14, %v993_v15  ;;  %v1085_v21 = vmul.f32 1.442695, %v1059_v4 }
 0x179   : > { %v1028_v24 = vsel %vm1012_vm12, %v2489_v12, 0.0  ;;  %v2686_v26 = vmax.f32 %v692_v23, %v2987_v33  ;;  %vm902_vm3 = vcmp.eq.s32.totalorder %v2986_v41, 1  ;;  %v1231_v8 = vsub.f32 %v1199_v40, %v2988_v13  ;;  %v1685_v28 = vpop.eup %1684 }
 0x17a   : > { %1694 = vpow2.f32 %v749_v45  ;;  %v1044_v42 = vadd.f32 %v1028_v24, %v932_v19  ;;  %v1140_v38 = vsel %vm1124_vm13, %v2987_v33, 0.0  ;;  %vm1014_vm6 = vcmp.eq.s32.totalorder %v2986_v41, 2  ;;  %v1687_v31 = vpop.eup %1686 }
 0x17b   : > { %1696 = vlog2.f32 %v1105_v46  ;;  %v724_v53 = vsub.f32 %v2478_v63, %v2686_v26  ;;  %v836_v0 = vsub.f32 %v2487_v25, %v2686_v26  ;;  %v948_v29 = vsub.f32 %v2489_v12, %v2686_v26  ;;  %v1689_v23 = vpop.eup %1688 }
 0x17c   : > { %vm2990_vm5 = vcmp.ne.s32.totalorder %v2989_v50, 4294967295  ;;  %1698 = vpow2.f32 %v861_v59  ;;  %v1060_v44 = vsub.f32 %v2987_v33, %v2686_v26  ;;  %v2704_v60 = vadd.f32 %v1140_v38, %v1044_v42  ;;  %v1691_v16 = vpop.eup %1690 }
 0x17d   : > { %v1247_v48 = vsel %vm2990_vm5, %v1231_v8, 0.0  ;;  %v1176_v1 = vmul.f32 0.6931472, %v1687_v31  ;;  %1700 = vpow2.f32 %v973_v22  ;;  %v751_v63 = vmul.f32 1.442695, %v724_v53  ;;  %v1693_v32 = vpop.eup %1692  ;;  %v2993_v8 = vld [vmem:[#allocation12_spill] sm:$0xff] }
 0x17e   : > { %v1262_v9 = vadd.f32 %v1261_v37, %v1247_v48  ;;  %v882_v25 = vadd.f32 %v1689_v23, %v1685_v28  ;;  %1702 = vpow2.f32 %v1085_v21  ;;  %v863_v27 = vmul.f32 1.442695, %v836_v0  ;;  %v2991_v21 = vld [vmem:[#allocation9_spill] sm:$0xff] }
 0x17f   : > { %v975_v12 = vmul.f32 1.442695, %v948_v29  ;;  %v1200_v14 = vadd.f32 %v1176_v1, %v2508_v56  ;;  %1704 = vpow2.f32 %v751_v63  ;;  %v1087_v15 = vmul.f32 1.442695, %v1060_v44 }
 0x180   : > { %v805_v4 = vsel %vm789_vm15, %v2505_v20, 0.0  ;;  %v994_v19 = vadd.f32 %v1691_v16, %v882_v25  ;;  %1706 = vpow2.f32 %v863_v27  ;;  %v677_v37 = vmax.f32 %v2505_v20, %v2511_v49 }
 0x181   : > { %v917_v52 = vsel %vm901_vm1, %v2511_v49, 0.0  ;;  %v1232_v40 = vsub.f32 %v1200_v14, %v2542_v36  ;;  %1708 = vpow2.f32 %v975_v12  ;;  %v1029_v56 = vsel %vm1013_vm2, %v2513_v43, 0.0 }
 0x182   : > { %v933_v45 = vadd.f32 %v917_v52, %v805_v4  ;;  %v1106_v59 = vadd.f32 %v1693_v32, %v994_v19  ;;  %1710 = vpow2.f32 %v1087_v15  ;;  %v693_v22 = vmax.f32 %v677_v37, %v2513_v43 }
 0x183   : > { %v1141_v46 = vsel %vm1125_vm8, %v2519_v55, 0.0  ;;  %vm2992_vm10 = vcmp.ne.s32.totalorder %v2991_v21, 4294967295  ;;  %v806_v36 = vsel %vm790_vm0, %v2528_v35, 0.0  ;;  %v678_v13 = vmax.f32 %v2528_v35, %v2530_v30 }
 0x184   : > { %v1248_v24 = vsel %vm2992_vm10, %v1232_v40, 0.0  ;;  %v1045_v33 = vadd.f32 %v1029_v56, %v933_v45  ;;  %vm1126_vm11 = vcmp.eq.s32.totalorder %v2986_v41, 3  ;;  %vm791_vm4 = vcmp.eq.s32.totalorder %v2993_v8, 0  ;;  %v1695_v42 = vpop.eup %1694 }
 0x185   : > { %v1263_v38 = vadd.f32 %v1262_v9, %v1248_v24  ;;  %1712 = vlog2.f32 %v1106_v59  ;;  %v2733_v28 = vmax.f32 %v693_v22, %v2519_v55  ;;  %v918_v53 = vsel %vm902_vm3, %v2530_v30, 0.0  ;;  %v1697_v0 = vpop.eup %1696 }
 0x186   : > { %v2738_v29 = vadd.f32 %v1141_v46, %v1045_v33  ;;  %v934_v31 = vadd.f32 %v918_v53, %v806_v36  ;;  %v694_v50 = vmax.f32 %v678_v13, %v2532_v2  ;;  %v1030_v48 = vsel %vm1014_vm6, %v2532_v2, 0.0  ;;  %v1699_v44 = vpop.eup %1698  ;;  %v2994_v33 = vld [vmem:[#allocation14_spill] sm:$0xff]  ;;  %v2996_v13 = vld [vmem:[#allocation13_spill] sm:$0xff] }
 0x187   : > { %vm903_vm12 = vcmp.eq.s32.totalorder %v2993_v8, 1  ;;  %v1178_v23 = vmul.f32 0.6931472, %v1697_v0  ;;  %v725_v9 = vsub.f32 %v2505_v20, %v2733_v28  ;;  %v837_v1 = vsub.f32 %v2511_v49, %v2733_v28  ;;  %v1701_v16 = vpop.eup %1700  ;;  %v2995_v36 = vld [vmem:[#allocation10_spill] sm:$0xff] }
 0x188   : > { %v949_v63 = vsub.f32 %v2513_v43, %v2733_v28  ;;  %v883_v25 = vadd.f32 %v1699_v44, %v1695_v42  ;;  %v1061_v27 = vsub.f32 %v2519_v55, %v2733_v28  ;;  %v1046_v12 = vadd.f32 %v1030_v48, %v934_v31  ;;  %v1703_v14 = vpop.eup %1702 }
 0x189   : > { %v2754_v32 = vmax.f32 %v694_v50, %v2540_v18  ;;  %vm1015_vm13 = vcmp.eq.s32.totalorder %v2993_v8, 2  ;;  %v1201_v20 = vadd.f32 %v1178_v23, %v2572_v61  ;;  %v753_v15 = vmul.f32 1.442695, %v725_v9  ;;  %v1705_v43 = vpop.eup %1704 }
 0x18a   : > { %v865_v4 = vmul.f32 1.442695, %v837_v1  ;;  %v977_v49 = vmul.f32 1.442695, %v949_v63  ;;  %vm1127_vm14 = vcmp.eq.s32.totalorder %v2993_v8, 3  ;;  %v995_v19 = vadd.f32 %v1701_v16, %v883_v25  ;;  %v1707_v40 = vpop.eup %1706 }
 0x18b   : > { %v1089_v37 = vmul.f32 1.442695, %v1061_v27  ;;  %v726_v55 = vsub.f32 %v2528_v35, %v2754_v32  ;;  %v838_v52 = vsub.f32 %v2530_v30, %v2754_v32  ;;  %v1233_v45 = vsub.f32 %v1201_v20, %v2597_v51  ;;  %v1709_v59 = vpop.eup %1708  ;;  %v2997_v20 = vld [vmem:[#allocation18_spill] sm:$0xff] }
 0x18c   : > { %1714 = vpow2.f32 %v753_v15  ;;  %v950_v61 = vsub.f32 %v2532_v2, %v2754_v32  ;;  %v1062_v56 = vsub.f32 %v2540_v18, %v2754_v32  ;;  %v1107_v22 = vadd.f32 %v1703_v14, %v995_v19  ;;  %v1711_v24 = vpop.eup %1710 }
 0x18d   : > { %v884_v46 = vadd.f32 %v1707_v40, %v1705_v43  ;;  %1716 = vpow2.f32 %v865_v4  ;;  %v755_v21 = vmul.f32 1.442695, %v726_v55  ;;  %v1249_v35 = vsel %vm1217_vm7, %v1233_v45, 0.0  ;;  %v2998_v4 = vld [vmem:[#allocation19_spill] sm:$0xff] }
 0x18e   : > { %1718 = vpow2.f32 %v977_v49  ;;  %v867_v30 = vmul.f32 1.442695, %v838_v52  ;;  %vm792_vm15 = vcmp.eq.s32.totalorder %v2994_v33, 0  ;;  %v1264_v51 = vadd.f32 %v1263_v38, %v1249_v35 }
 0x18f   : > { %v2773_v2 = vadd.f32 %v2996_v13, %v2995_v36  ;;  %1720 = vlog2.f32 %v1107_v22  ;;  %v996_v42 = vadd.f32 %v1709_v59, %v884_v46  ;;  %v1713_v53 = vpop.eup %1712  ;;  %v979_v0 = vmul.f32 1.442695, %v950_v61 }
 0x190   : > { %1722 = vpow2.f32 %v1089_v37  ;;  %v1142_v31 = vsel %vm1126_vm11, %v2540_v18, 0.0  ;;  %v807_v54 = vsel %vm791_vm4, %v2552_v10, 0.0  ;;  %v1180_v50 = vmul.f32 0.6931472, %v1713_v53 }
 0x191   : > { %v1108_v48 = vadd.f32 %v1711_v24, %v996_v42  ;;  %1724 = vpow2.f32 %v755_v21  ;;  %v2781_v38 = vadd.f32 %v1142_v31, %v1046_v12  ;;  %v1091_v44 = vmul.f32 1.442695, %v1062_v56  ;;  %v3000_v24 = vld [vmem:[#allocation20_spill] sm:$0xff] }
 0x192   : > { %1726 = vpow2.f32 %v867_v30  ;;  %v679_v23 = vmax.f32 %v2552_v10, %v2559_v58  ;;  %v919_v9 = vsel %vm903_vm12, %v2559_v58, 0.0  ;;  %v1202_v18 = vadd.f32 %v1180_v50, %v2615_v47 }
 0x193   : > { %1728 = vlog2.f32 %v1108_v48  ;;  %v935_v1 = vadd.f32 %v919_v9, %v807_v54  ;;  %vm904_vm7 = vcmp.eq.s32.totalorder %v2994_v33, 1  ;;  %v1031_v16 = vsel %vm1015_vm13, %v2561_v34, 0.0 }
 0x194   : > { %1730 = vpow2.f32 %v979_v0  ;;  %v695_v63 = vmax.f32 %v679_v23, %v2561_v34  ;;  %vm1016_vm1 = vcmp.eq.s32.totalorder %v2994_v33, 2  ;;  %v1234_v25 = vsub.f32 %v1202_v18, %v2621_v39 }
 0x195   : > { %vm1219_vm2 = vcmp.ne.s32.totalorder %v2211_v5, 4294967295  ;;  %v1047_v27 = vadd.f32 %v1031_v16, %v935_v1  ;;  %v1143_v47 = vsel %vm1127_vm14, %v2569_v11, 0.0  ;;  %1732 = vpow2.f32 %v1091_v44 }
 0x196   : > { %v1715_v12 = vpop.eup %1714  ;;  %v2801_v14 = vmax.f32 %v695_v63, %v2569_v11  ;;  %v808_v15 = vsel %vm792_vm15, %v2997_v20, 0.0  ;;  %v680_v49 = vmax.f32 %v2997_v20, %v2998_v4  ;;  %v1250_v43 = vsel %vm1218_vm9, %v1234_v25, 0.0 }
 0x197   : > { %v1717_v39 = vpop.eup %1716  ;;  %v2999_v19 = vmov 0.0   ;;  %v2813_v55 = vadd.f32 %v1143_v47, %v1047_v27  ;;  %v920_v52 = vsel %vm904_vm7, %v2998_v4, 0.0  ;;  %vm1128_vm8 = vcmp.eq.s32.totalorder %v2994_v33, 3 }
 0x198   : > { %v1513_v37 = vsel %vm1219_vm2, 1.0, %v2999_v19  ;;  %v1719_v40 = vpop.eup %1718  ;;  %v1265_v45 = vadd.f32 %v1264_v51, %v1250_v43  ;;  %v885_v61 = vadd.f32 %v1717_v39, %v1715_v12  ;;  %v727_v56 = vsub.f32 %v2552_v10, %v2801_v14 }
 0x199   : > { %v839_v3 = vsub.f32 %v2559_v58, %v2801_v14  ;;  %v1721_v59 = vpop.eup %1720  ;;  %vm1220_vm9 = vcmp.ne.s32.totalorder %v2213_v6, 4294967295  ;;  %v951_v22 = vsub.f32 %v2561_v34, %v2801_v14  ;;  %v1063_v46 = vsub.f32 %v2569_v11, %v2801_v14 }
 0x19a   : > { %v936_v21 = vadd.f32 %v920_v52, %v808_v15  ;;  %v696_v35 = vmax.f32 %v680_v49, %v3000_v24  ;;  %v1723_v30 = vpop.eup %1722  ;;  %v1182_v51 = vmul.f32 0.6931472, %v1721_v59  ;;  %v997_v36 = vadd.f32 %v1719_v40, %v885_v61 }
 0x19b   : > { %v757_v13 = vmul.f32 1.442695, %v727_v56  ;;  %v869_v10 = vmul.f32 1.442695, %v839_v3  ;;  %v1725_v42 = vpop.eup %1724  ;;  %v981_v53 = vmul.f32 1.442695, %v951_v22  ;;  %v1319_v5 = vadd.f32 %v1513_v37, %v2773_v2 }
 0x19c   : > { %v1093_v58 = vmul.f32 1.442695, %v1063_v46  ;;  %v1032_v0 = vsel %vm1016_vm1, %v3000_v24, 0.0  ;;  %v2833_v34 = vmax.f32 %v696_v35, %v2601_v57  ;;  %v1727_v31 = vpop.eup %1726  ;;  %v1203_v11 = vadd.f32 %v1182_v51, %v2660_v62 }
 0x19d   : > { %v1109_v54 = vadd.f32 %v1723_v30, %v997_v36  ;;  %1734 = vpow2.f32 %v757_v13  ;;  %v1048_v50 = vadd.f32 %v1032_v0, %v936_v21  ;;  %v1729_v48 = vpop.eup %1728  ;;  %v886_v44 = vadd.f32 %v1727_v31, %v1725_v42 }
 0x19e   : > { %1736 = vpow2.f32 %v869_v10  ;;  %v728_v23 = vsub.f32 %v2997_v20, %v2833_v34  ;;  %v840_v9 = vsub.f32 %v2998_v4, %v2833_v34  ;;  %v1731_v18 = vpop.eup %1730  ;;  %v1235_v1 = vsub.f32 %v1203_v11, %v2677_v17 }
 0x19f   : > { %v1184_v63 = vmul.f32 0.6931472, %v1729_v48  ;;  %1738 = vlog2.f32 %v1109_v54  ;;  %v952_v62 = vsub.f32 %v3000_v24, %v2833_v34  ;;  %v998_v16 = vadd.f32 %v1731_v18, %v886_v44  ;;  %v1733_v47 = vpop.eup %1732 }
 0x1a0   : > { %1740 = vpow2.f32 %v981_v53  ;;  %v759_v25 = vmul.f32 1.442695, %v728_v23  ;;  %v871_v27 = vmul.f32 1.442695, %v840_v9  ;;  %v1251_v12 = vsel %vm1219_vm2, %v1235_v1, 0.0 }
 0x1a1   : > { %v1204_v20 = vadd.f32 %v1184_v63, %v2686_v26  ;;  %1742 = vpow2.f32 %v1093_v58  ;;  %v983_v15 = vmul.f32 1.442695, %v952_v62  ;;  %v1266_v4 = vadd.f32 %v1265_v45, %v1251_v12 }
 0x1a2   : > { %v1110_v49 = vadd.f32 %v1733_v47, %v998_v16  ;;  %1744 = vpow2.f32 %v759_v25  ;;  %v1064_v17 = vsub.f32 %v2601_v57, %v2833_v34  ;;  %v1144_v43 = vsel %vm1128_vm8, %v2601_v57, 0.0 }
 0x1a3   : > { %v1236_v39 = vsub.f32 %v1204_v20, %v2704_v60  ;;  %1746 = vpow2.f32 %v871_v27  ;;  %v1160_v26 = vadd.f32 %v1144_v43, %v1048_v50  ;;  %v1514_v45 = vsel %vm1220_vm9, 1.0, %v2999_v19 }
 0x1a4   : > { %1748 = vlog2.f32 %v1110_v49  ;;  %v1095_v52 = vmul.f32 1.442695, %v1064_v17  ;;  %v1320_v3 = vadd.f32 %v1514_v45, %v1319_v5  ;;  %vm1221_vm0 = vcmp.ne.s32.totalorder %v2215_v7, 4294967295 }
 0x1a5   : > { %v1252_v40 = vsel %vm1220_vm9, %v1236_v39, 0.0  ;;  %1750 = vpow2.f32 %v983_v15  ;;  %v1515_v2 = vsel %vm1221_vm0, 1.0, %v2999_v19  ;;  %vm1222_vm3 = vcmp.ne.s32.totalorder %v2986_v41, 4294967295 }
 0x1a6   : > { %v1267_v61 = vadd.f32 %v1266_v4, %v1252_v40  ;;  %1752 = vpow2.f32 %v1095_v52  ;;  %v1321_v35 = vadd.f32 %v1515_v2, %v1320_v3  ;;  %v1516_v51 = vsel %vm1222_vm3, 1.0, %v2999_v19 }
 0x1a7   : > { %v1735_v60 = vpop.eup %1734  ;;  %vm1223_vm6 = vcmp.ne.s32.totalorder %v2993_v8, 4294967295  ;;  %vm1224_vm5 = vcmp.ne.s32.totalorder %v2994_v33, 4294967295  ;;  %vm1331_vm10 = vcmask 1040384  }
 0x1a8   : > { %v1737_v56 = vpop.eup %1736  ;;  %v1517_v48 = vsel %vm1223_vm6, 1.0, %v2999_v19  ;;  %v1518_v9 = vsel %vm1224_vm5, 1.0, %v2999_v19 }
 0x1a9   : > { %v1739_v57 = vpop.eup %1738  ;;  %v887_v37 = vadd.f32 %v1737_v56, %v1735_v60 }
 0x1aa   : > { %v1741_v59 = vpop.eup %1740  ;;  %v1186_v22 = vmul.f32 0.6931472, %v1739_v57 }
 0x1ab   : > { %v1743_v46 = vpop.eup %1742  ;;  %v999_v21 = vadd.f32 %v1741_v59, %v887_v37 }
 0x1ac   : > { %v1745_v6 = vpop.eup %1744  ;;  %v1205_v24 = vadd.f32 %v1186_v22, %v2733_v28  ;;  %v1322_v28 = vadd.f32 %v1516_v51, %v1321_v35 }
 0x1ad   : > { %v1747_v30 = vpop.eup %1746  ;;  %v1111_v36 = vadd.f32 %v1743_v46, %v999_v21 }
 0x1ae   : > { %v1749_v13 = vpop.eup %1748  ;;  %v1237_v10 = vsub.f32 %v1205_v24, %v2738_v29  ;;  %v888_v42 = vadd.f32 %v1747_v30, %v1745_v6  ;;  %v1323_v23 = vadd.f32 %v1517_v48, %v1322_v28 }
 0x1af   : > { %v1751_v53 = vpop.eup %1750  ;;  %v1188_v58 = vmul.f32 0.6931472, %v1749_v13  ;;  %1754 = vlog2.f32 %v1111_v36 }
 0x1b0   : > { %v1253_v0 = vsel %vm1221_vm0, %v1237_v10, 0.0  ;;  %v1000_v31 = vadd.f32 %v1751_v53, %v888_v42  ;;  %v1753_v11 = vpop.eup %1752 }
 0x1b1   : > { %v1268_v54 = vadd.f32 %v1267_v61, %v1253_v0  ;;  %v1206_v50 = vadd.f32 %v1188_v58, %v2754_v32  ;;  %v1324_v32 = vadd.f32 %v1518_v9, %v1323_v23 }
 0x1b2   : > { %v1112_v29 = vadd.f32 %v1753_v11, %v1000_v31 }
 0x1b3   : > { %v1238_v44 = vsub.f32 %v1206_v50, %v2781_v38  ;;  %v1325_v16 = vrot.slane %v1324_v32, 4 }
 0x1b4   : > { %1756 = vlog2.f32 %v1112_v29 }
 0x1b5   : > { %v1254_v7 = vsel %vm1222_vm3, %v1238_v44, 0.0  ;;  %v1326_v47 = vadd.f32 %v1325_v16, %v1324_v32 }
 0x1b6   : > { %v1269_v18 = vadd.f32 %v1268_v54, %v1254_v7 }
 0x1b7   : > { %v1327_v15 = vrot.slane %v1326_v47, 2 }
 0x1b9   : > { %v1755_v1 = vpop.eup %1754  ;;  %v1328_v17 = vadd.f32 %v1327_v15, %v1326_v47 }
 0x1ba   : > { %v1190_v63 = vmul.f32 0.6931472, %v1755_v1 }
 0x1bb   : > { %v1329_v43 = vrot.slane %v1328_v17, 1 }
 0x1bc   : > { %v1207_v62 = vadd.f32 %v1190_v63, %v2801_v14 }
 0x1bd   : > { %v1330_v52 = vadd.f32 %v1329_v43, %v1328_v17 }
 0x1be   : > { %v1757_v25 = vpop.eup %1756  ;;  %v1239_v38 = vsub.f32 %v1207_v62, %v2813_v55 }
 0x1bf   : > { %v1192_v27 = vmul.f32 0.6931472, %v1757_v25 }
 0x1c0   : > { %v1255_v41 = vsel %vm1223_vm6, %v1239_v38, 0.0 }
 0x1c1   : > { %v1270_v12 = vadd.f32 %v1269_v18, %v1255_v41  ;;  %v1208_v19 = vadd.f32 %v1192_v27, %v2833_v34 }
 0x1c3   : > { %v1240_v20 = vsub.f32 %v1208_v19, %v1160_v26 }
 0x1c5   : > { %v1256_v4 = vsel %vm1224_vm5, %v1240_v20, 0.0 }
 0x1c6   : > { %v1271_v14 = vadd.f32 %v1270_v12, %v1256_v4 }
 0x1c8   : > { %v1272_v49 = vrot.slane %v1271_v14, 4 }
 0x1ca   : > { %v1273_v39 = vadd.f32 %v1272_v49, %v1271_v14 }
 0x1cc   : > { %v1274_v55 = vrot.slane %v1273_v39, 2 }
 0x1ce   : > { %v1275_v8 = vadd.f32 %v1274_v55, %v1273_v39 }
 0x1d0   : > { %v1276_v5 = vrot.slane %v1275_v8, 1 }
 0x1d2   : > { %v1277_v34 = vadd.f32 %v1276_v5, %v1275_v8 }
 0x1d4   : > { %v1332_v33 = vsel %vm1331_vm10, %v1277_v34, %v1330_v52 }
 0x1d5   : > { %1333 = vst [vmem:[%s237_s29] sm:$0x3] %v1332_v33 }
 0x1d6   : > { %1801 = shalt.err (!%p1798_p4)
}
 0x1d7   : > { %s1802_s11 = scalar_lea.hbm %s2894_s7, 32  ;;  %s1806_s22 = scalar_lea.hbm %s2946_s3, 64 }
 0x1d8   : > { %p1803_p7 = scmp.ne.s32.totalorder %s2894_s7, %s1802_s11  ;;  %p1807_p1 = scmp.lt.u32.totalorder %s2894_s7, %s2946_s3 }
 0x1d9   : > { %p1808_p3 = scmp.lt.u32.totalorder %s1806_s22, %s1802_s11  ;;  %p1810_p8 = scmp.lt.u32.totalorder %s1802_s11, %s2894_s7 }
 0x1da   : > { %p1804_p10 = pnand %p1803_p7, %p3001_p11 }
 0x1db   : > { %p1809_p9 = por %p1808_p3, %p1807_p1 }
 0x1dc   : > { %p1805_p12 = pneg %p1804_p10 }
 0x1dd   : > { %p1811_p0 = por %p1810_p8, %p1809_p9 }
 0x1df   : > { %p1812_p6 = pnand %p1811_p0, %p1805_p12 }
 0x1e1   : > { %1815 = shalt.err (!%p1812_p6)
}
 0x1e2   : > { %1535 = dma.vmem_to_hbm [thread:$0]  (%p3001_p11), %s2896_s30, 32, %s2894_s7, %s1335_s18  }
 0x1e3 PF: > { %s1361_s21 = sand.u32 1, %s1850_s12   ;;  %p3002_p13 = scmp.ne.s32.totalorder %s2967_s27, 0 }
 0x1e4   : > { %p3003_p2 = scmp.ge.s32.totalorder %s1870_s17, 2  ;;  %s1362_s28 = scalar_lea.sflag [#allocation4], %s1361_s21 }
 0x1e6   : > { %p1542_p5 = pnand %p3003_p2, %p3002_p13 }
 0x1e8   : > { %1845 = dma.done.wait (!%p1542_p5), %s1362_s28, 32  }
 0x1e9   : > { %1847 = vsyncadd (!%p1542_p5), %s1362_s28, 4294967264  ;;  %s19_s17 = sadd.s32 1, %s1870_s17   ;;  %s3004_s12 = smov %s1854_s13 }
 0x1ea   : > { %p16_p4 = scmp.ge.s32.totalorder %s19_s17, 4   ;;  %s3005_s13 = smov %s1858_s14 }
 0x1eb   : > { %s3006_s14 = smov %s1953_s26  ;;  %s3007_s15 = smov %s1866_s16 }
 0x1ec   : > { %s3008_s16 = smov %s3010_s20  ;;  %18 = sbr.rel (!%p16_p4) target bundleno = 6 (0x6), region = 83 }
 0x1f3   :  { %1367 = vsyncpa [#allocation3], 1 }
 0x1f4   :  { %1369 = vsyncpa [#allocation3 + $0x1], 1 }
 0x1f5   :  { %1370 = vsyncpa [#allocation4], 1 }
 0x1f6   :  { %1372 = vsyncpa [#allocation4 + $0x1], 1 }

</bundles_post_ra>
